<compile_context>
chip_gen: v7x
topology: tpu7x:2x2x1
jax: 0.10.0
libtpu: 0.0.40
codegen_flags: <defaults>
</compile_context>

<pallas_src>
import functools

import jax
import jax.numpy as jnp
from jax.experimental import pallas as pl
from jax.experimental.pallas import tpu as pltpu


def _round_up(n, m):
    return ((n + m - 1) // m) * m


def _choose_tile(m_rows, block_rows):
    """Pick a row tile that (a) keeps >=2 grid steps so the 'parallel' axis can
    split across v7x's two TensorCores and (b) divides m_rows nearly evenly to
    minimize padded-row waste."""
    n_tiles = max(pl.cdiv(m_rows, block_rows), 2)
    tm = _round_up(pl.cdiv(m_rows, n_tiles), 8)
    m_pad = _round_up(m_rows, tm)
    return tm, m_pad


def _sublayer_connection_kernel(x_ref, a2_ref, b2_ref, w_ref, bias_ref, o_ref,
                                *, eps, feat_dim):
    x = x_ref[...]  # (TM, D) float32

    # --- LayerNorm, one-pass statistics (torch semantics: unbiased std,
    #     eps added to std, not to var) ---
    s1 = jnp.sum(x, axis=-1, keepdims=True)
    s2 = jnp.sum(x * x, axis=-1, keepdims=True)
    inv_n = 1.0 / feat_dim
    mean = s1 * inv_n
    var_unbiased = (s2 - s1 * mean) * (1.0 / (feat_dim - 1))
    var_unbiased = jnp.maximum(var_unbiased, 0.0)   # guard one-pass cancellation
    std = jnp.sqrt(var_unbiased)
    inv = pl.reciprocal(std + eps, approx=True)     # EUP slot, per-row
    normed = a2_ref[...] * ((x - mean) * inv) + b2_ref[...]

    # --- sublayer: Linear(D -> D) on the MXU in bf16, f32 accumulate ---
    y = jnp.dot(normed.astype(jnp.bfloat16), w_ref[...],
                preferred_element_type=jnp.float32)

    # --- dropout (eval mode = identity) + residual, all in f32 ---
    o_ref[...] = x + (y + bias_ref[...])


def sublayer_connection(x, a2, b2, w, bias, *, eps=1e-6, block_rows=1024):
    """x: (B, S, D) float32, w: (D, D) [in, out] layout. Returns (B, S, D) f32."""
    B, S, D = x.shape
    M = B * S
    x2 = x.reshape(M, D)

    tm, m_pad = _choose_tile(M, block_rows)
    if m_pad != M:
        # Zero rows are harmless: centered=0 -> normed=b_2 -> y=b_2@W+bias; sliced off.
        x2 = jnp.pad(x2, ((0, m_pad - M), (0, 0)))

    a2_2d = a2.reshape(1, D).astype(jnp.float32)
    b2_2d = b2.reshape(1, D).astype(jnp.float32)
    bias_2d = bias.reshape(1, D).astype(jnp.float32)
    w_bf16 = w.astype(jnp.bfloat16)

    kernel = functools.partial(_sublayer_connection_kernel, eps=eps, feat_dim=D)
    grid = (m_pad // tm,)

    # Grid-invariant operands: constant index map + single buffer (no re-DMA,
    # no wasted second VMEM buffer).
    def _invariant(shape):
        return pl.BlockSpec(shape, lambda i: (0,) * len(shape),
                            pipeline_mode=pl.Buffered(1))

    out = pl.pallas_call(
        kernel,
        out_shape=jax.ShapeDtypeStruct((m_pad, D), jnp.float32),
        grid=grid,
        in_specs=[
            pl.BlockSpec((tm, D), lambda i: (i, 0)),   # x  (tiled, double-buffered)
            _invariant((1, D)),                        # a_2 (VMEM-resident)
            _invariant((1, D)),                        # b_2
            _invariant((D, D)),                        # W (in, out), bf16
            _invariant((1, D)),                        # bias
        ],
        out_specs=pl.BlockSpec((tm, D), lambda i: (i, 0)),
        compiler_params=pltpu.CompilerParams(
            dimension_semantics=("parallel",),
            # TM=1024 f32 x/out double-buffered + matmul intermediates + W
            # comfortably fit; 48 MiB stays under v7x's 64 MiB physical VMEM
            # and lifts v5e's 16 MiB default scoped limit.
            vmem_limit_bytes=48 * 1024 * 1024),
        cost_estimate=pl.CostEstimate(
            flops=2 * m_pad * D * D + 10 * m_pad * D,
            transcendentals=2 * m_pad,
            bytes_accessed=2 * m_pad * D * 4 + D * D * 2 + 3 * D * 4),
    )(x2, a2_2d, b2_2d, w_bf16, bias_2d)

    return out[:M].reshape(B, S, D)


def _reference_f32(x, a2, b2, w, bias, eps=1e-6):
    mean = jnp.mean(x, axis=-1, keepdims=True)
    centered = x - mean
    var = jnp.sum(centered * centered, axis=-1, keepdims=True) / (x.shape[-1] - 1)
    std = jnp.sqrt(var)
    normed = a2 * centered / (std + eps) + b2
    y = normed @ w + bias
    return x + y


if __name__ == "__main__":
    key = jax.random.PRNGKey(0)
    B, S, D = 2, 8, 768  # hidden = 768 as implied by init_mBloSA / LayerNorm(size)

    kx, kw = jax.random.split(key)
    x = jax.random.normal(kx, (B, S, D), dtype=jnp.float32)

    # LayerNorm params (module init: ones / zeros)
    a2 = jnp.ones((D,), dtype=jnp.float32)
    b2 = jnp.zeros((D,), dtype=jnp.float32)

    # Sublayer linear: xavier-uniform weight (torch stores (out,in); we pass
    # the transposed (in,out) layout for x @ W), zero bias.
    limit = (6.0 / (D + D)) ** 0.5
    w_torch = jax.random.uniform(kw, (D, D), dtype=jnp.float32,
                                 minval=-limit, maxval=limit)
    w = w_torch.T
    bias = jnp.zeros((D,), dtype=jnp.float32)

    out = sublayer_connection(x, a2, b2, w, bias)
    out = jax.block_until_ready(out)

    ref = _reference_f32(x, a2, b2, w, bias)
    assert out.shape == (B, S, D)
    # Tolerance accounts for bf16 MXU operands (f32 accumulate), the EUP
    # approx reciprocal, and one-pass variance.
    assert jnp.allclose(out, ref, atol=5e-2, rtol=5e-2), float(
        jnp.max(jnp.abs(out - ref)))

    print("KERNEL_OK")
</pallas_src>

<mosaic_0001>
module attributes {stable_mosaic.version = 11 : i64} {
  func.func @_sublayer_connection_kernel(%arg0: i32, %arg1: memref<8x768xf32, #tpu.memory_space<vmem>>, %arg2: memref<1x768xf32, #tpu.memory_space<vmem>>, %arg3: memref<1x768xf32, #tpu.memory_space<vmem>>, %arg4: memref<768x768xbf16, #tpu.memory_space<vmem>>, %arg5: memref<1x768xf32, #tpu.memory_space<vmem>>, %arg6: memref<8x768xf32, #tpu.memory_space<vmem>>) attributes {dimension_semantics = [#tpu.dimension_semantics<parallel>], iteration_bounds = array<i64: 2>, scalar_prefetch = 0 : i64, scratch_operands = 0 : i64, tpu.core_type = #tpu.core_type<tc>, window_params = [{transform_indices = @transform_0, window_bounds = array<i64: 8, 768>}, {pipeline_mode = #tpu.pipeline_mode<synchronous>, transform_indices = @transform_1, window_bounds = array<i64: 1, 768>}, {pipeline_mode = #tpu.pipeline_mode<synchronous>, transform_indices = @transform_2, window_bounds = array<i64: 1, 768>}, {pipeline_mode = #tpu.pipeline_mode<synchronous>, transform_indices = @transform_3, window_bounds = array<i64: 768, 768>}, {pipeline_mode = #tpu.pipeline_mode<synchronous>, transform_indices = @transform_4, window_bounds = array<i64: 1, 768>}, {transform_indices = @transform_5, window_bounds = array<i64: 8, 768>}]} {
    %c0 = arith.constant 0 : index
    %c0_0 = arith.constant 0 : index
    %0 = vector.load %arg1[%c0, %c0_0] : memref<8x768xf32, #tpu.memory_space<vmem>>, vector<8x768xf32>
    %cst = arith.constant dense<0.000000e+00> : vector<8xf32>
    %1 = vector.multi_reduction <add>, %0, %cst [1] : vector<8x768xf32> to vector<8xf32>
    %2 = vector.shape_cast %1 : vector<8xf32> to vector<8x1xf32>
    %3 = arith.mulf %0, %0 : vector<8x768xf32>
    %cst_1 = arith.constant dense<0.000000e+00> : vector<8xf32>
    %4 = vector.multi_reduction <add>, %3, %cst_1 [1] : vector<8x768xf32> to vector<8xf32>
    %5 = vector.shape_cast %4 : vector<8xf32> to vector<8x1xf32>
    %cst_2 = arith.constant 0.00130208337 : f32
    %6 = vector.broadcast %cst_2 : f32 to vector<8x1xf32>
    %7 = arith.mulf %2, %6 : vector<8x1xf32>
    %8 = arith.mulf %2, %7 : vector<8x1xf32>
    %9 = arith.subf %5, %8 : vector<8x1xf32>
    %cst_3 = arith.constant 0.00130378094 : f32
    %10 = vector.broadcast %cst_3 : f32 to vector<8x1xf32>
    %11 = arith.mulf %9, %10 : vector<8x1xf32>
    %cst_4 = arith.constant 0.000000e+00 : f32
    %12 = vector.broadcast %cst_4 : f32 to vector<8x1xf32>
    %13 = arith.maximumf %11, %12 : vector<8x1xf32>
    %14 = math.sqrt %13 : vector<8x1xf32>
    %cst_5 = arith.constant 9.99999997E-7 : f32
    %15 = vector.broadcast %cst_5 : f32 to vector<8x1xf32>
    %16 = arith.addf %14, %15 : vector<8x1xf32>
    %17 = tpu.reciprocal %16 {approx = true} : vector<8x1xf32> -> vector<8x1xf32>
    %c0_6 = arith.constant 0 : index
    %c0_7 = arith.constant 0 : index
    %18 = vector.load %arg2[%c0_6, %c0_7] : memref<1x768xf32, #tpu.memory_space<vmem>>, vector<1x768xf32>
    %19 = vector.broadcast %7 : vector<8x1xf32> to vector<8x768xf32>
    %20 = arith.subf %0, %19 : vector<8x768xf32>
    %21 = vector.broadcast %17 : vector<8x1xf32> to vector<8x768xf32>
    %22 = arith.mulf %20, %21 : vector<8x768xf32>
    %23 = vector.broadcast %18 : vector<1x768xf32> to vector<8x768xf32>
    %24 = arith.mulf %23, %22 : vector<8x768xf32>
    %c0_8 = arith.constant 0 : index
    %c0_9 = arith.constant 0 : index
    %25 = vector.load %arg3[%c0_8, %c0_9] : memref<1x768xf32, #tpu.memory_space<vmem>>, vector<1x768xf32>
    %26 = vector.broadcast %25 : vector<1x768xf32> to vector<8x768xf32>
    %27 = arith.addf %24, %26 : vector<8x768xf32>
    %28 = arith.truncf %27 : vector<8x768xf32> to vector<8x768xbf16>
    %c0_10 = arith.constant 0 : index
    %c0_11 = arith.constant 0 : index
    %29 = vector.load %arg4[%c0_10, %c0_11] : memref<768x768xbf16, #tpu.memory_space<vmem>>, vector<768x768xbf16>
    %cst_12 = arith.constant dense<0.000000e+00> : vector<8x768xf32>
    %30 = tpu.matmul %28, %29, %cst_12 {dimension_numbers = #tpu.dot_dimension_numbers<[1], [0], [0], [1], [0, 0, 1, 1], [], []>} : vector<8x768xbf16>, vector<768x768xbf16>, vector<8x768xf32> -> vector<8x768xf32>
    %c0_13 = arith.constant 0 : index
    %c0_14 = arith.constant 0 : index
    %31 = vector.load %arg5[%c0_13, %c0_14] : memref<1x768xf32, #tpu.memory_space<vmem>>, vector<1x768xf32>
    %32 = vector.broadcast %31 : vector<1x768xf32> to vector<8x768xf32>
    %33 = arith.addf %30, %32 : vector<8x768xf32>
    %34 = arith.addf %0, %33 : vector<8x768xf32>
    %c0_15 = arith.constant 0 : index
    %c0_16 = arith.constant 0 : index
    %35 = vector.load %arg6[%c0_15, %c0_16] : memref<8x768xf32, #tpu.memory_space<vmem>>, vector<8x768xf32>
    tpu.vector_store %arg6[%c0_15, %c0_16], %34 {strides = array<i32>} : memref<8x768xf32, #tpu.memory_space<vmem>>, vector<8x768xf32>,
    return
  }
  func.func @transform_0(%arg0: i32) -> (i32, i32) {
    %c0_i32 = arith.constant 0 : i32
    %c0_i32_0 = arith.constant 0 : i32
    return %arg0, %c0_i32 : i32, i32
  }
  func.func @transform_1(%arg0: i32) -> (i32, i32) {
    %c0_i32 = arith.constant 0 : i32
    %c0_i32_0 = arith.constant 0 : i32
    %c0_i32_1 = arith.constant 0 : i32
    return %c0_i32, %c0_i32_0 : i32, i32
  }
  func.func @transform_2(%arg0: i32) -> (i32, i32) {
    %c0_i32 = arith.constant 0 : i32
    %c0_i32_0 = arith.constant 0 : i32
    %c0_i32_1 = arith.constant 0 : i32
    return %c0_i32, %c0_i32_0 : i32, i32
  }
  func.func @transform_3(%arg0: i32) -> (i32, i32) {
    %c0_i32 = arith.constant 0 : i32
    %c0_i32_0 = arith.constant 0 : i32
    %c0_i32_1 = arith.constant 0 : i32
    return %c0_i32, %c0_i32_0 : i32, i32
  }
  func.func @transform_4(%arg0: i32) -> (i32, i32) {
    %c0_i32 = arith.constant 0 : i32
    %c0_i32_0 = arith.constant 0 : i32
    %c0_i32_1 = arith.constant 0 : i32
    return %c0_i32, %c0_i32_0 : i32, i32
  }
  func.func @transform_5(%arg0: i32) -> (i32, i32) {
    %c0_i32 = arith.constant 0 : i32
    %c0_i32_0 = arith.constant 0 : i32
    return %arg0, %c0_i32 : i32, i32
  }
}

</mosaic_0001>

<bundles_post_ra>
// kernel: tpu_custom_call.1
= control target key start
LH: loop header
LB: loop body
LE: loop exit
PB: predicated region body
PF: predicated region fallthrough
CT: control target
= control target key end

     0   :  { %10 = vsyncpa [#allocation3], 0  ;;  %s4188_s0 = inlined_call_operand.hbm [shape: f32[16,768], index: 0, kind: input, shape index: {}]   ;;  %s4189_s1 = inlined_call_operand.hbm [shape: f32[1,768], index: 1, kind: input, shape index: {}]   ;;  %s4190_s2 = inlined_call_operand.hbm [shape: f32[1,768], index: 2, kind: input, shape index: {}]   ;;  %s4191_s3 = inlined_call_operand.hbm [shape: bf16[768,768], index: 3, kind: input, shape index: {}]   ;;  %s4192_s4 = inlined_call_operand.hbm [shape: f32[1,768], index: 4, kind: input, shape index: {}]   ;;  %s4193_s5 = inlined_call_operand.hbm [shape: f32[16,768], index: 5, kind: output, shape index: {}]  }
   0x1   :  { %12 = vsyncpa [#allocation3 + $0x1], 0 }
   0x2   :  { %13 = vsyncpa [#allocation6], 0 }
   0x3   :  { %14 = vsyncpa [#allocation9], 0 }
   0x4   :  { %15 = vsyncpa [#allocation4], 0 }
   0x5   :  { %17 = vsyncpa [#allocation4 + $0x1], 0  ;;  %s3786_s18 = smov 0   ;;  %s3788_s19 = smov 0  }
   0x6   :  { %s3790_s20 = smov 0   ;;  %s3792_s21 = smov 0  }
   0x7 LB: > { %s3748_s22 = smov [#allocation5]   ;;  %s3807_s24 = sadd.s32 4294967295, %s3746_s21   ;;  %s3746_s21 = sphi %s3792_s21, %s4216_s21   ;;  %s3742_s20 = sphi %s3790_s20, %s4215_s20   ;;  %s3738_s19 = sphi %s3788_s19, %s4214_s19   ;;  %s3734_s18 = sphi %s3786_s18, %s4213_s18  }
   0x8   : > { %s177_s23 = sshll.u32 %s3748_s22, 4  ;;  %p2692_p0 = scmp.ge.s32.totalorder %s3746_s21, 1  ;;  %s178_s23 = int_to_ptr.vmem [resolvable:$true] %s177_s23 }
   0x9   : > { %p4194_p1 = scmp.eq.s32.totalorder %s3807_s24, 0  ;;  %p164_p2 = scmp.lt.s32.totalorder %s3746_s21, 3 }
   0xa   : > { %s3749_s26 = smov [#allocation8]   ;;  %s3750_s29 = smov [#allocation7]  }
   0xb   : > { %p3812_p3 = pnand %p2692_p0, %p164_p2  ;;  %s198_s27 = sshll.u32 %s3749_s26, 4  ;;  %s3819_s27 = int_to_ptr.vmem [resolvable:$true] %s198_s27 }
   0xc   : > { %s188_s30 = sshll.u32 %s3750_s29, 4  ;;  %s3530_s8 = scalar_lea.hbm %s4189_s1, 96  ;;  %s3827_s30 = int_to_ptr.vmem [resolvable:$true] %s188_s30 }
   0xd   : > { %s4197_s25 = scalar_select %p3812_p3, 1, 0 }
   0xe   : > { %p3019_p5 = pneg %p3812_p3  ;;  %p3531_p7 = scmp.ne.s32.totalorder %s4189_s1, %s3530_s8 }
   0xf   : > { %p3537_p11 = scmp.lt.u32.totalorder %s3530_s8, %s4189_s1 }
  0x10   : > { %p3823_p6 = pnand %p3019_p5, %p4194_p1 }
  0x12   : > { %p3837_p8 = pneg %p3823_p6 }
  0x14   : > { %p3533_p9 = pnand %p3837_p8, %p3531_p7 }
  0x16   : > { %p3534_p10 = pneg %p3533_p9 }
  0x18   : > { %p3539_p12 = pnand %p3537_p11, %p3534_p10 }
  0x1a   : > { %3542 = shalt.err (!%p3539_p12)
}
  0x1b   : > { %s3543_s14 = scalar_lea.vmem %s178_s23, 96  ;;  %p3551_p5 = scmp.lt.s32.totalorder %s178_s23, %s178_s23 }
  0x1c   : > { %p3544_p13 = scmp.ne.s32.totalorder %s178_s23, %s3543_s14  ;;  %p3552_p4 = scmp.lt.s32.totalorder %s3543_s14, %s3543_s14 }
  0x1e   : > { %p3546_p0 = pnand %p3544_p13, %p3837_p8  ;;  %p3553_p1 = por %p3552_p4, %p3551_p5 }
  0x20   : > { %p3547_p2 = pneg %p3546_p0 }
  0x22   : > { %p3554_p3 = pnand %p3553_p1, %p3547_p2 }
  0x24   : > { %3557 = shalt.err (!%p3554_p3)
}
  0x25   : > { %3022 = dma.hbm_to_vmem [thread:$0]  (!%p3823_p6), %s4189_s1, 96, %s178_s23, [#allocation6]  }
  0x26   : > { %s3558_s26 = scalar_lea.hbm %s4191_s3, 36864 }
  0x27   : > { %p3559_p7 = scmp.ne.s32.totalorder %s4191_s3, %s3558_s26  ;;  %p3565_p1 = scmp.lt.u32.totalorder %s3558_s26, %s4191_s3 }
  0x29   : > { %p3561_p9 = pnand %p3559_p7, %p3837_p8 }
  0x2b   : > { %p3562_p4 = pneg %p3561_p9 }
  0x2d   : > { %p3567_p3 = pnand %p3565_p1, %p3562_p4 }
  0x2f   : > { %3570 = shalt.err (!%p3567_p3)
}
  0x30   : > { %s3571_s23 = scalar_lea.vmem %s3819_s27, 36864  ;;  %p3579_p13 = scmp.lt.s32.totalorder %s3819_s27, %s3819_s27 }
  0x31   : > { %p3572_p10 = scmp.ne.s32.totalorder %s3819_s27, %s3571_s23  ;;  %p3580_p0 = scmp.lt.s32.totalorder %s3571_s23, %s3571_s23 }
  0x33   : > { %p3574_p11 = pnand %p3572_p10, %p3837_p8  ;;  %p3581_p2 = por %p3580_p0, %p3579_p13 }
  0x35   : > { %p3575_p12 = pneg %p3574_p11 }
  0x37   : > { %p3582_p5 = pnand %p3581_p2, %p3575_p12 }
  0x39   : > { %3585 = shalt.err (!%p3582_p5)
}
  0x3a   : > { %s3751_s9 = smov 384   ;;  %s3752_s10 = smov 24  }
  0x3b   : > { %3028 = dma.hbm_to_vmem [thread:$0]  (!%p3823_p6), %s4191_s3, 36864, %s3819_s27, [#allocation9], %s3751_s9, %s3751_s9, %s3752_s10  }
  0x3c   : > { %s3586_s16 = scalar_lea.hbm %s4190_s2, 96 }
  0x3d   : > { %p3587_p7 = scmp.ne.s32.totalorder %s4190_s2, %s3586_s16  ;;  %p3593_p1 = scmp.lt.u32.totalorder %s3586_s16, %s4190_s2 }
  0x3f   : > { %p3589_p9 = pnand %p3587_p7, %p3837_p8 }
  0x41   : > { %p3590_p4 = pneg %p3589_p9 }
  0x43   : > { %p3595_p3 = pnand %p3593_p1, %p3590_p4 }
  0x45   : > { %3598 = shalt.err (!%p3595_p3)
}
  0x46   : > { %s3599_s27 = scalar_lea.vmem %s3827_s30, 96  ;;  %p3607_p13 = scmp.lt.s32.totalorder %s3827_s30, %s3827_s30 }
  0x47   : > { %p3600_p10 = scmp.ne.s32.totalorder %s3827_s30, %s3599_s27  ;;  %p3608_p0 = scmp.lt.s32.totalorder %s3599_s27, %s3599_s27 }
  0x49   : > { %p3602_p11 = pnand %p3600_p10, %p3837_p8  ;;  %p3609_p2 = por %p3608_p0, %p3607_p13 }
  0x4b   : > { %p3603_p12 = pneg %p3602_p11 }
  0x4d   : > { %p3610_p5 = pnand %p3609_p2, %p3603_p12 }
  0x4f   : > { %3613 = shalt.err (!%p3610_p5)
}
  0x50   : > { %3025 = dma.hbm_to_vmem [thread:$0]  (!%p3823_p6), %s4190_s2, 96, %s3827_s30, [#allocation6]  }
  0x51   : > { %s3753_s8 = smov [#allocation10]   ;;  %s3614_s12 = scalar_lea.hbm %s4192_s4, 96 }
  0x52   : > { %s212_s23 = sshll.u32 %s3753_s8, 4  ;;  %p3615_p7 = scmp.ne.s32.totalorder %s4192_s4, %s3614_s12  ;;  %s213_s23 = int_to_ptr.vmem [resolvable:$true] %s212_s23 }
  0x53   : > { %p3621_p1 = scmp.lt.u32.totalorder %s3614_s12, %s4192_s4 }
  0x54   : > { %p3617_p9 = pnand %p3615_p7, %p3837_p8 }
  0x56   : > { %p3618_p4 = pneg %p3617_p9 }
  0x58   : > { %p3623_p3 = pnand %p3621_p1, %p3618_p4 }
  0x5a   : > { %3626 = shalt.err (!%p3623_p3)
}
  0x5b   : > { %s3627_s30 = scalar_lea.vmem %s213_s23, 96  ;;  %p3635_p13 = scmp.lt.s32.totalorder %s213_s23, %s213_s23 }
  0x5c   : > { %p3628_p10 = scmp.ne.s32.totalorder %s213_s23, %s3627_s30  ;;  %p3636_p0 = scmp.lt.s32.totalorder %s3627_s30, %s3627_s30 }
  0x5e   : > { %p3630_p11 = pnand %p3628_p10, %p3837_p8  ;;  %p3637_p2 = por %p3636_p0, %p3635_p13 }
  0x60   : > { %p3631_p12 = pneg %p3630_p11 }
  0x62   : > { %p3638_p5 = pnand %p3637_p2, %p3631_p12 }
  0x64   : > { %3641 = shalt.err (!%p3638_p5)
}
  0x65   : > { %3031 = dma.hbm_to_vmem [thread:$0]  (!%p3823_p6), %s4192_s4, 96, %s213_s23, [#allocation9]  }
  0x66   : > { %s2691_s11 = sadd.s32 4294967294, %s3746_s21   ;;  %s3919_s28 = sadd.s32 1, %s3746_s21  }
  0x67   : > { %s27_s26 = ssub.s32 %s3746_s21, %s3919_s28  ;;  %s30_s29 = sadd.s32 1, %s3742_s20 }
  0x68   : > { %p28_p8 = scmp.eq.s32.totalorder %s27_s26, 0  ;;  %p37_p7 = scmp.ne.s32.totalorder %s3742_s20, %s3738_s19 }
  0x69   : > { %p38_p9 = scmp.eq.s32.totalorder %s3746_s21, 0  ;;  %p43_p4 = scmp.ne.s32.totalorder %s3738_s19, %s3734_s18 }
  0x6a   : > { %s3930_s27 = scalar_select %p28_p8, %s3742_s20, %s30_s29  }
  0x6b   : > { %p39_p1 = por %p38_p9, %p37_p7  ;;  %p4200_p3 = scmp.eq.s32.totalorder %s3807_s24, 0 }
  0x6c   : > { %p151_p6 = scmp.eq.s32.totalorder %s3807_s24, 1  ;;  %p157_p11 = scmp.eq.s32.totalorder %s2691_s11, 1 }
  0x6d   : > { %p3934_p10 = por %p4200_p3, %p43_p4  ;;  %p3044_p12 = scmp.lt.s32.totalorder %s3746_s21, 2 }
  0x6e   : > { %s223_s7 = sand.u32 1, %s3742_s20   ;;  %p3941_p13 = por %p151_p6, %p37_p7 }
  0x6f   : > { %p3945_p0 = por %p157_p11, %p43_p4  ;;  %s2995_s9 = smul.u32 48, %s223_s7 }
  0x70   : > { %s4202_s8 = scalar_select %p3941_p13, 1, 0 }
  0x71   : > { %s4203_s23 = scalar_select %p3945_p0, 1, 0 }
  0x72   : > { %s2996_s10 = smul.u32 768, %s3746_s21  ;;  %p3950_p2 = pnand %p3044_p12, %p39_p1 }
  0x73   : > { %s227_s16 = scalar_lea.vmem [#allocation2], %s2995_s9  ;;  %s224_s17 = scalar_lea.sflag [#allocation3], %s223_s7 }
  0x74   : > { %s3957_s15 = scalar_lea.hbm %s4188_s0, %s2996_s10  ;;  %s235_s30 = sshll.u32 %s227_s16, 4  ;;  %s3959_s30 = int_to_ptr.vmem [resolvable:$true] %s235_s30 }
  0x75   : > { %s3642_s22 = scalar_lea.hbm %s3957_s15, 768  ;;  %p3644_p8 = pneg %p3950_p2 }
  0x76   : > { %p3643_p5 = scmp.ne.s32.totalorder %s3957_s15, %s3642_s22  ;;  %s3647_s29 = scalar_lea.hbm %s4188_s0, 1536 }
  0x77   : > { %p3648_p4 = scmp.lt.u32.totalorder %s3957_s15, %s4188_s0  ;;  %p3649_p1 = scmp.lt.u32.totalorder %s3647_s29, %s3642_s22 }
  0x78   : > { %p3645_p7 = pnand %p3644_p8, %p3643_p5  ;;  %p3651_p6 = scmp.lt.u32.totalorder %s3642_s22, %s3957_s15 }
  0x79   : > { %p3650_p3 = por %p3649_p1, %p3648_p4 }
  0x7a   : > { %p3646_p9 = pneg %p3645_p7 }
  0x7b   : > { %p3652_p11 = por %p3651_p6, %p3650_p3 }
  0x7d   : > { %p3653_p12 = pnand %p3652_p11, %p3646_p9 }
  0x7f   : > { %3656 = shalt.err (!%p3653_p12)
}
  0x80   : > { %s3657_s7 = scalar_lea.vmem %s3959_s30, 768  ;;  %s3754_s9 = smov [#allocation2]  }
  0x81   : > { %p3658_p5 = scmp.ne.s32.totalorder %s3959_s30, %s3657_s7  ;;  %s3662_s14 = sshll.u32 %s3754_s9, 4  ;;  %s3663_s14 = int_to_ptr.vmem [resolvable:$false] %s3662_s14 }
  0x82   : > { %s3664_s16 = scalar_lea.vmem %s3663_s14, 1536  ;;  %p3665_p13 = scmp.lt.s32.totalorder %s3959_s30, %s3663_s14 }
  0x83   : > { %p3660_p7 = pnand %p3658_p5, %p3644_p8  ;;  %p3666_p4 = scmp.lt.s32.totalorder %s3664_s16, %s3657_s7 }
  0x85   : > { %p3661_p0 = pneg %p3660_p7  ;;  %p3667_p1 = por %p3666_p4, %p3665_p13 }
  0x87   : > { %p3668_p3 = pnand %p3667_p1, %p3661_p0 }
  0x89   : > { %3671 = shalt.err (!%p3668_p3)
}
  0x8a   : > { %3035 = dma.hbm_to_vmem [thread:$0]  (!%p3950_p2), %s3957_s15, 768, %s3959_s30, %s224_s17  }
  0x8b   : > { %p4205_p9 = scmp.ne.s32.totalorder %s4197_s25, 0 }
  0x8c   : > { %s3989_s22 = sand.u32 (!%p4205_p9), 1, %s3738_s19  }
  0x8d   : > { %244 = sbr.rel (%p4205_p9) target bundleno = 843 (0x34b), region = 40  ;;  %s247_s26 = scalar_lea.sflag (!%p4205_p9), [#allocation3], %s3989_s22 }
  0x8e   : > { %s2997_s11 = smul.u32 (!%p4205_p9), 48, %s3989_s22 }
  0x90   : > { %s3995_s29 = scalar_lea.vmem (!%p4205_p9), [#allocation2], %s2997_s11 }
  0x94   : > { %3717 = dma.done.wait (%p3934_p10), %s247_s26, 768  }
  0x95   : > { %3719 = vsyncadd (%p3934_p10), %s247_s26, 4294966528  ;;  %p4206_p13 = scmp.eq.s32.totalorder %s3807_s24, 0 }
  0x97   : > { %3721 = dma.done.wait (%p4206_p13), [#allocation6], 192   ;;  %p4207_p0 = pmov %p4206_p13 }
  0x99   : > { %3723 = vsyncadd (%p4207_p0), [#allocation6], 4294967104  ;;  %p4208_p2 = pmov %p4207_p0 }
  0x9a   : > { %p4209_p8 = pmov %p4207_p0 }
  0x9b   : > { %3725 = dma.done.wait (%p4208_p2), [#allocation9], 36960  }
  0x9c   : > { %3727 = vsyncadd (%p4209_p8), [#allocation9], 4294930336  ;;  %v4010_v0 = vld [vmem:[%s3995_s29] sm:$0xff]  ;;  %v4013_v1 = vld [vmem:[%s3995_s29 + $0x8] sm:$0xff]  ;;  %s4119_s25 = scalar_lea.vmem [#allocation11], %s2997_s11  ;;  %s2998_s6 = smul.u32 768, %s3807_s24 }
  0x9d   : > { %v4016_v2 = vld [vmem:[%s3995_s29 + $0x10] sm:$0xff]  ;;  %v4019_v3 = vld [vmem:[%s3995_s29 + $0x18] sm:$0xff]  ;;  %v299_v4 = vadd.f32 %v4013_v1, %v4010_v0  ;;  %v306_v5 = vmul.f32 %v4010_v0, %v4010_v0  ;;  %v307_v6 = vmul.f32 %v4013_v1, %v4013_v1  ;;  %v4030_v8 = vld [vmem:[%s3995_s29 + $0x20] sm:$0xff]  ;;  %s2583_s12 = sshll.u32 %s4119_s25, 4  ;;  %s2569_s24 = scalar_lea.sflag [#allocation4], %s3989_s22  ;;  %s4144_s12 = int_to_ptr.vmem [resolvable:$true] %s2583_s12 }
  0x9e   : > { %v308_v7 = vmul.f32 %v4016_v2, %v4016_v2  ;;  %v3088_v9 = vld [vmem:[#allocation8 + $0x4] ss:$24 sps:$4 sm:$0xff]   ;;  %v309_v11 = vmul.f32 %v4019_v3, %v4019_v3  ;;  %v3092_v15 = vld [vmem:[#allocation8] ss:$24 sps:$4 sm:$0xff]   ;;  %v310_v18 = vmul.f32 %v4030_v8, %v4030_v8  ;;  %v3094_v20 = vld [vmem:[#allocation8 + $0x34] ss:$24 sps:$4 sm:$0xff]   ;;  %s4142_s17 = scalar_lea.hbm %s4193_s5, %s2998_s6 }
  0x9f   : > { %v300_v10 = vadd.f32 %v299_v4, %v4016_v2  ;;  %v312_v12 = vadd.f32 %v307_v6, %v306_v5  ;;  %v3090_v13 = vld [vmem:[#allocation8 + $0x304] ss:$24 sps:$4 sm:$0xff]   ;;  %2187 = vmatprep.subr.bf16.mxu0 %v3088_v9  ;;  %v3093_v16 = vld [vmem:[#allocation8 + $0x300] ss:$24 sps:$4 sm:$0xff]   ;;  %v3096_v21 = vld [vmem:[#allocation8 + $0x334] ss:$24 sps:$4 sm:$0xff]  }
  0xa0   : > { %v4036_v14 = vld [vmem:[%s3995_s29 + $0x28] sm:$0xff]  ;;  %2228 = vmatprep.subr.bf16.mxu1 %v3090_v13  ;;  %2188 = vmatpush1.bf16.msra.mxu0 %v3092_v15  ;;  %s3672_s10 = scalar_lea.vmem %s4144_s12, 768  ;;  %p4210_p6 = scmp.ne.s32.totalorder %s4202_s8, 0 }
  0xa1   : > { %v301_v17 = vadd.f32 %v300_v10, %v4019_v3  ;;  %v313_v19 = vadd.f32 %v312_v12, %v308_v7  ;;  %2229 = vmatpush1.bf16.msra.mxu1 %v3093_v16  ;;  %v3098_v22 = vld [vmem:[#allocation8 + $0x30] ss:$24 sps:$4 sm:$0xff]   ;;  %v311_v24 = vmul.f32 %v4036_v14, %v4036_v14  ;;  %2189 = vmatprep.subr.bf16.mxu0 %v3094_v20  ;;  %v3100_v27 = vld [vmem:[#allocation8 + $0x64] ss:$24 sps:$4 sm:$0xff]   ;;  %v3104_v31 = vld [vmem:[#allocation8 + $0x60] ss:$24 sps:$4 sm:$0xff]   ;;  %p3673_p10 = scmp.ne.s32.totalorder %s4144_s12, %s3672_s10 }
  0xa2   : > { %v3099_v26 = vld [vmem:[#allocation8 + $0x330] ss:$24 sps:$4 sm:$0xff]   ;;  %2230 = vmatprep.subr.bf16.mxu1 %v3096_v21  ;;  %v3102_v30 = vld [vmem:[#allocation8 + $0x364] ss:$24 sps:$4 sm:$0xff]   ;;  %v3105_v32 = vld [vmem:[#allocation8 + $0x360] ss:$24 sps:$4 sm:$0xff]  }
  0xa3   : > { %v302_v23 = vadd.f32 %v301_v17, %v4030_v8  ;;  %v314_v25 = vadd.f32 %v313_v19, %v309_v11  ;;  %v3106_v34 = vld [vmem:[#allocation8 + $0x94] ss:$24 sps:$4 sm:$0xff]   ;;  %v3110_v36 = vld [vmem:[#allocation8 + $0x90] ss:$24 sps:$4 sm:$0xff]   ;;  %v3112_v38 = vld [vmem:[#allocation8 + $0xc4] ss:$24 sps:$4 sm:$0xff]   ;;  %p3674_p11 = pnand %p3673_p10, %p4210_p6 }
  0xa4   : > { %2190 = vmatpush1.bf16.msra.mxu0 %v3098_v22  ;;  %v3108_v35 = vld [vmem:[#allocation8 + $0x394] ss:$24 sps:$4 sm:$0xff]   ;;  %v3111_v37 = vld [vmem:[#allocation8 + $0x390] ss:$24 sps:$4 sm:$0xff]   ;;  %v3114_v39 = vld [vmem:[#allocation8 + $0x3c4] ss:$24 sps:$4 sm:$0xff]  }
  0xa5   : > { %v303_v28 = vadd.f32 %v302_v23, %v4036_v14  ;;  %v315_v29 = vadd.f32 %v314_v25, %v310_v18  ;;  %2231 = vmatpush1.bf16.msra.mxu1 %v3099_v26  ;;  %2191 = vmatprep.subr.bf16.mxu0 %v3100_v27  ;;  %v3116_v40 = vld [vmem:[#allocation8 + $0xc0] ss:$24 sps:$4 sm:$0xff]   ;;  %v3118_v42 = vld [vmem:[#allocation8 + $0xf4] ss:$24 sps:$4 sm:$0xff]   ;;  %v3122_v44 = vld [vmem:[#allocation8 + $0xf0] ss:$24 sps:$4 sm:$0xff]   ;;  %p3675_p12 = pneg %p3674_p11 }
  0xa6   : > { %2232 = vmatprep.subr.bf16.mxu1 %v3102_v30  ;;  %v3117_v41 = vld [vmem:[#allocation8 + $0x3c0] ss:$24 sps:$4 sm:$0xff]   ;;  %v3120_v43 = vld [vmem:[#allocation8 + $0x3f4] ss:$24 sps:$4 sm:$0xff]   ;;  %v3123_v45 = vld [vmem:[#allocation8 + $0x3f0] ss:$24 sps:$4 sm:$0xff]  }
  0xa7   : > { %304 = vadd.xlane.f32.xlu0 %v303_v28  ;;  %v316_v33 = vadd.f32 %v315_v29, %v311_v24  ;;  %v3124_v46 = vld [vmem:[#allocation8 + $0x124] ss:$24 sps:$4 sm:$0xff]   ;;  %v3128_v48 = vld [vmem:[#allocation8 + $0x120] ss:$24 sps:$4 sm:$0xff]   ;;  %v3130_v50 = vld [vmem:[#allocation8 + $0x154] ss:$24 sps:$4 sm:$0xff]  }
  0xa8   : > { %2192 = vmatpush1.bf16.msra.mxu0 %v3104_v31  ;;  %v3126_v47 = vld [vmem:[#allocation8 + $0x424] ss:$24 sps:$4 sm:$0xff]   ;;  %v3129_v49 = vld [vmem:[#allocation8 + $0x420] ss:$24 sps:$4 sm:$0xff]   ;;  %v3132_v51 = vld [vmem:[#allocation8 + $0x454] ss:$24 sps:$4 sm:$0xff]  }
  0xa9   : > { %2233 = vmatpush1.bf16.msra.mxu1 %v3105_v32  ;;  %2193 = vmatprep.subr.bf16.mxu0 %v3106_v34  ;;  %v3134_v52 = vld [vmem:[#allocation8 + $0x150] ss:$24 sps:$4 sm:$0xff]   ;;  %v3136_v54 = vld [vmem:[#allocation8 + $0x184] ss:$24 sps:$4 sm:$0xff]   ;;  %v3140_v56 = vld [vmem:[#allocation8 + $0x180] ss:$24 sps:$4 sm:$0xff]  }
  0xaa   : > { %2234 = vmatprep.subr.bf16.mxu1 %v3108_v35  ;;  %v3135_v53 = vld [vmem:[#allocation8 + $0x450] ss:$24 sps:$4 sm:$0xff]   ;;  %v3138_v55 = vld [vmem:[#allocation8 + $0x484] ss:$24 sps:$4 sm:$0xff]   ;;  %v3141_v57 = vld [vmem:[#allocation8 + $0x480] ss:$24 sps:$4 sm:$0xff]  }
  0xab   : > { %317 = vadd.xlane.f32.xlu0 %v316_v33  ;;  %v3142_v58 = vld [vmem:[#allocation8 + $0x1b4] ss:$24 sps:$4 sm:$0xff]   ;;  %v3146_v60 = vld [vmem:[#allocation8 + $0x1b0] ss:$24 sps:$4 sm:$0xff]   ;;  %v3148_v62 = vld [vmem:[#allocation8 + $0x1e4] ss:$24 sps:$4 sm:$0xff]  }
  0xac   : > { %2194 = vmatpush1.bf16.msra.mxu0 %v3110_v36  ;;  %v3144_v59 = vld [vmem:[#allocation8 + $0x4b4] ss:$24 sps:$4 sm:$0xff]   ;;  %v3147_v61 = vld [vmem:[#allocation8 + $0x4b0] ss:$24 sps:$4 sm:$0xff]   ;;  %v3150_v63 = vld [vmem:[#allocation8 + $0x4e4] ss:$24 sps:$4 sm:$0xff]  }
  0xad   : > { %2235 = vmatpush1.bf16.msra.mxu1 %v3111_v37  ;;  %2195 = vmatprep.subr.bf16.mxu0 %v3112_v38  ;;  %v3152_v4 = vld [vmem:[#allocation8 + $0x1e0] ss:$24 sps:$4 sm:$0xff]   ;;  %v3154_v6 = vld [vmem:[#allocation8 + $0x214] ss:$24 sps:$4 sm:$0xff]   ;;  %v3158_v9 = vld [vmem:[#allocation8 + $0x210] ss:$24 sps:$4 sm:$0xff]  }
  0xae   : > { %2236 = vmatprep.subr.bf16.mxu1 %v3114_v39  ;;  %v3153_v5 = vld [vmem:[#allocation8 + $0x4e0] ss:$24 sps:$4 sm:$0xff]   ;;  %v3156_v7 = vld [vmem:[#allocation8 + $0x514] ss:$24 sps:$4 sm:$0xff]   ;;  %v3159_v10 = vld [vmem:[#allocation8 + $0x510] ss:$24 sps:$4 sm:$0xff]  }
  0xaf   : > { %v3160_v11 = vld [vmem:[#allocation8 + $0x244] ss:$24 sps:$4 sm:$0xff]   ;;  %v3164_v13 = vld [vmem:[#allocation8 + $0x240] ss:$24 sps:$4 sm:$0xff]   ;;  %v3166_v16 = vld [vmem:[#allocation8 + $0x274] ss:$24 sps:$4 sm:$0xff]  }
  0xb0   : > { %2196 = vmatpush1.bf16.msra.mxu0 %v3116_v40  ;;  %v3162_v12 = vld [vmem:[#allocation8 + $0x544] ss:$24 sps:$4 sm:$0xff]   ;;  %v3165_v15 = vld [vmem:[#allocation8 + $0x540] ss:$24 sps:$4 sm:$0xff]   ;;  %v3168_v17 = vld [vmem:[#allocation8 + $0x574] ss:$24 sps:$4 sm:$0xff]   ;;  %v347_v40 = vlaneseq }
  0xb1   : > { %2237 = vmatpush1.bf16.msra.mxu1 %v3117_v41  ;;  %2197 = vmatprep.subr.bf16.mxu0 %v3118_v42  ;;  %v3170_v18 = vld [vmem:[#allocation8 + $0x270] ss:$24 sps:$4 sm:$0xff]   ;;  %v3172_v20 = vld [vmem:[#allocation8 + $0x2a4] ss:$24 sps:$4 sm:$0xff]   ;;  %v3176_v22 = vld [vmem:[#allocation8 + $0x2a0] ss:$24 sps:$4 sm:$0xff]  }
  0xb2   : > { %2238 = vmatprep.subr.bf16.mxu1 %v3120_v43  ;;  %v3171_v19 = vld [vmem:[#allocation8 + $0x570] ss:$24 sps:$4 sm:$0xff]   ;;  %v3174_v21 = vld [vmem:[#allocation8 + $0x5a4] ss:$24 sps:$4 sm:$0xff]   ;;  %v3177_v23 = vld [vmem:[#allocation8 + $0x5a0] ss:$24 sps:$4 sm:$0xff]  }
  0xb3   : > { %v3178_v24 = vld [vmem:[#allocation8 + $0x2d4] ss:$24 sps:$4 sm:$0xff]   ;;  %v3182_v26 = vld [vmem:[#allocation8 + $0x2d0] ss:$24 sps:$4 sm:$0xff]   ;;  %v3186_v28 = vld [vmem:[#allocation8 + $0x604] ss:$24 sps:$4 sm:$0xff]  }
  0xb4   : > { %2198 = vmatpush1.bf16.msra.mxu0 %v3122_v44  ;;  %v3180_v25 = vld [vmem:[#allocation8 + $0x5d4] ss:$24 sps:$4 sm:$0xff]   ;;  %v3183_v27 = vld [vmem:[#allocation8 + $0x5d0] ss:$24 sps:$4 sm:$0xff]   ;;  %v348_v44 = vshrl.u32 %v347_v40, 7  ;;  %s3755_s13 = smov [#allocation11]  }
  0xb5   : > { %2239 = vmatpush1.bf16.msra.mxu1 %v3123_v45  ;;  %2199 = vmatprep.subr.bf16.mxu0 %v3124_v46  ;;  %v3189_v29 = vld [vmem:[#allocation8 + $0xc] ss:$24 sps:$4 sm:$0xff]   ;;  %v3199_v40 = vld [vmem:[#allocation8 + $0x68] ss:$24 sps:$4 sm:$0xff]   ;;  %s3676_s7 = sshll.u32 %s3755_s13, 4  ;;  %s3677_s7 = int_to_ptr.vmem [resolvable:$false] %s3676_s7 }
  0xb6   : > { %2240 = vmatprep.subr.bf16.mxu1 %v3126_v47  ;;  %v4045_v45 = vsub.s32 1, %v348_v44  ;;  %v4047_v46 = vsub.s32 3, %v348_v44  ;;  %v4049_v47 = vsub.s32 0, %v348_v44  ;;  %s3678_s9 = scalar_lea.vmem %s3677_s7, 1536  ;;  %p3679_p5 = scmp.lt.s32.totalorder %s4144_s12, %s3677_s7 }
  0xb7   : > { %p3680_p7 = scmp.lt.s32.totalorder %s3678_s9, %s3672_s10 }
  0xb8   : > { %2200 = vmatpush1.bf16.msra.mxu0 %v3128_v48  ;;  %v4051_v48 = vsub.s32 2, %v348_v44 }
  0xb9   : > { %2241 = vmatpush1.bf16.msra.mxu1 %v3129_v49  ;;  %2201 = vmatprep.subr.bf16.mxu0 %v3130_v50  ;;  %v333_v49 = vld [vmem:[#allocation5] sm:$0x3f]  ;;  %v4053_v50 = vsub.s32 5, %v348_v44  ;;  %p3681_p4 = por %p3680_p7, %p3679_p5 }
  0xba   : > { %2242 = vmatprep.subr.bf16.mxu1 %v3132_v51  ;;  %v4055_v51 = vsub.s32 4, %v348_v44  ;;  %v3205_v44 = vld [vmem:[#allocation8 + $0x98] ss:$24 sps:$4 sm:$0xff]  }
  0xbb   : > { %p3682_p1 = pnand %p3681_p4, %p3675_p12 }
  0xbc   : > { %2202 = vmatpush1.bf16.msra.mxu0 %v3134_v52  ;;  %v383_v52 = vld [vmem:[#allocation7] sm:$0x3f] }
  0xbd   : > { %2243 = vmatpush1.bf16.msra.mxu1 %v3135_v53  ;;  %2203 = vmatprep.subr.bf16.mxu0 %v3136_v54  ;;  %v354_v53 = vrot.slane %v333_v49, %v4045_v45  ;;  %v362_v54 = vrot.slane %v333_v49, %v4047_v46 }
  0xbe   : > { %2244 = vmatprep.subr.bf16.mxu1 %v3138_v55  ;;  %v350_v55 = vrot.slane %v333_v49, %v4049_v47 }
  0xc0   : > { %2204 = vmatpush1.bf16.msra.mxu0 %v3140_v56  ;;  %v358_v56 = vrot.slane %v333_v49, %v4051_v48 }
  0xc1   : > { %2245 = vmatpush1.bf16.msra.mxu1 %v3141_v57  ;;  %2205 = vmatprep.subr.bf16.mxu0 %v3142_v58  ;;  %v392_v57 = vrot.slane %v383_v52, %v4045_v45  ;;  %v400_v58 = vrot.slane %v383_v52, %v4047_v46 }
  0xc2   : > { %2246 = vmatprep.subr.bf16.mxu1 %v3144_v59  ;;  %v370_v59 = vrot.slane %v333_v49, %v4053_v50 }
  0xc4   : > { %2206 = vmatpush1.bf16.msra.mxu0 %v3146_v60  ;;  %v366_v60 = vrot.slane %v333_v49, %v4055_v51  ;;  %v3210_v49 = vld [vmem:[#allocation8 + $0x6c4] ss:$24 sps:$4 sm:$0xff]  }
  0xc5   : > { %2247 = vmatpush1.bf16.msra.mxu1 %v3147_v61  ;;  %2207 = vmatprep.subr.bf16.mxu0 %v3148_v62 }
  0xc6   : > { %2248 = vmatprep.subr.bf16.mxu1 %v3150_v63 }
  0xc8   : > { %2208 = vmatpush1.bf16.msra.mxu0 %v3152_v4 }
  0xc9   : > { %2249 = vmatpush1.bf16.msra.mxu1 %v3153_v5  ;;  %2209 = vmatprep.subr.bf16.mxu0 %v3154_v6  ;;  %v388_v6 = vrot.slane %v383_v52, %v4049_v47 }
  0xca   : > { %2250 = vmatprep.subr.bf16.mxu1 %v3156_v7  ;;  %v396_v7 = vrot.slane %v383_v52, %v4051_v48 }
  0xcc   : > { %2210 = vmatpush1.bf16.msra.mxu0 %v3158_v9 }
  0xcd   : > { %2251 = vmatpush1.bf16.msra.mxu1 %v3159_v10  ;;  %2211 = vmatprep.subr.bf16.mxu0 %v3160_v11 }
  0xce   : > { %2252 = vmatprep.subr.bf16.mxu1 %v3162_v12 }
  0xd0   : > { %2212 = vmatpush1.bf16.msra.mxu0 %v3164_v13 }
  0xd1   : > { %2253 = vmatpush1.bf16.msra.mxu1 %v3165_v15  ;;  %2213 = vmatprep.subr.bf16.mxu0 %v3166_v16 }
  0xd2   : > { %2254 = vmatprep.subr.bf16.mxu1 %v3168_v17 }
  0xd4   : > { %2214 = vmatpush1.bf16.msra.mxu0 %v3170_v18 }
  0xd5   : > { %2255 = vmatpush1.bf16.msra.mxu1 %v3171_v19  ;;  %2215 = vmatprep.subr.bf16.mxu0 %v3172_v20 }
  0xd6   : > { %2256 = vmatprep.subr.bf16.mxu1 %v3174_v21 }
  0xd8   : > { %2216 = vmatpush1.bf16.msra.mxu0 %v3176_v22 }
  0xd9   : > { %2257 = vmatpush1.bf16.msra.mxu1 %v3177_v23  ;;  %2217 = vmatprep.subr.bf16.mxu0 %v3178_v24 }
  0xda   : > { %2258 = vmatprep.subr.bf16.mxu1 %v3180_v25 }
  0xdc   : > { %2218 = vmatpush1.bf16.msra.mxu0 %v3182_v26 }
  0xdd   : > { %2259 = vmatpush1.bf16.msra.mxu1 %v3183_v27  ;;  %2269 = vmatprep.subr.bf16.mxu0 %v3186_v28  ;;  %v3184_v28 = vld [vmem:[#allocation8 + $0x600] ss:$24 sps:$4 sm:$0xff]  }
  0xde   : > { %2310 = vmatprep.subr.bf16.mxu1 %v3189_v29  ;;  %v3187_v29 = vld [vmem:[#allocation8 + $0x8] ss:$24 sps:$4 sm:$0xff]  }
 0x134   : > { %v305_v30 = vpop.xlane.xlu0 %304 }
 0x135   : > { %v319_v31 = vmul.f32 0.0013020834, %v305_v30 }
 0x137   : > { %v320_v32 = vmul.f32 %v319_v31, %v305_v30  ;;  %v335_v61 = vsub.f32 %v4013_v1, %v319_v31  ;;  %v337_v62 = vsub.f32 %v4019_v3, %v319_v31  ;;  %v334_v63 = vsub.f32 %v4010_v0, %v319_v31 }
 0x138   : > { %v318_v33 = vpop.xlane.xlu0 %317  ;;  %v336_v4 = vsub.f32 %v4016_v2, %v319_v31  ;;  %v339_v9 = vsub.f32 %v4036_v14, %v319_v31  ;;  %v338_v10 = vsub.f32 %v4030_v8, %v319_v31  ;;  %v408_v3 = vrot.slane %v383_v52, %v4053_v50 }
 0x139   : > { %v321_v34 = vsub.f32 %v318_v33, %v320_v32  ;;  %v404_v0 = vrot.slane %v383_v52, %v4055_v51  ;;  %v3192_v32 = vld [vmem:[#allocation8 + $0x634] ss:$24 sps:$4 sm:$0xff]  }
 0x13a   : > { %v3195_v33 = vld [vmem:[#allocation8 + $0x3c] ss:$24 sps:$4 sm:$0xff]   ;;  %v3213_v52 = vld [vmem:[#allocation8 + $0xcc] ss:$24 sps:$4 sm:$0xff]  }
 0x13b   : > { %v322_v35 = vmul.f32 0.0013037809, %v321_v34 }
 0x13d   : > { %v323_v36 = vmax.f32 %v322_v35, 0.0  ;;  %v3190_v35 = vld [vmem:[#allocation8 + $0x630] ss:$24 sps:$4 sm:$0xff]  }
 0x13f   : > { %3520 = vrsqrt.f32 %v323_v36  ;;  %vm326_vm0 = vcmp.eq.f32.partialorder %v323_v36, inf  ;;  %v329_v39 = vand.u32 2147483648, %v323_v36  ;;  %vm328_vm1 = vcmp.eq.f32.partialorder %v323_v36, 0.0 }
 0x149   : > { %v3521_v37 = vpop.eup %3520 }
 0x14a   : > { %v325_v38 = vmul.f32 %v3521_v37, %v323_v36  ;;  %v3198_v37 = vld [vmem:[#allocation8 + $0x664] ss:$24 sps:$4 sm:$0xff]  }
 0x14c   : > { %v327_v41 = vsel %vm326_vm0, %v323_v36, %v325_v38  ;;  %v3193_v36 = vld [vmem:[#allocation8 + $0x38] ss:$24 sps:$4 sm:$0xff]   ;;  %v3201_v38 = vld [vmem:[#allocation8 + $0x6c] ss:$24 sps:$4 sm:$0xff]  }
 0x14d   : > { %v330_v42 = vsel %vm328_vm1, %v329_v39, %v327_v41  ;;  %v3196_v39 = vld [vmem:[#allocation8 + $0x660] ss:$24 sps:$4 sm:$0xff]   ;;  %v3204_v41 = vld [vmem:[#allocation8 + $0x694] ss:$24 sps:$4 sm:$0xff]  }
 0x14e   : > { %v331_v43 = vadd.f32 1e-06, %v330_v42  ;;  %v3207_v42 = vld [vmem:[#allocation8 + $0x9c] ss:$24 sps:$4 sm:$0xff]  }
 0x150   : > { %3522 = vrcp.f32 %v331_v43  ;;  %v3202_v43 = vld [vmem:[#allocation8 + $0x690] ss:$24 sps:$4 sm:$0xff]  }
 0x15a   : > { %v3523_v5 = vpop.eup %3522 }
 0x15b   : > { %v341_v11 = vmul.f32 %v3523_v5, %v335_v61  ;;  %v343_v12 = vmul.f32 %v3523_v5, %v337_v62  ;;  %v340_v13 = vmul.f32 %v3523_v5, %v334_v63  ;;  %v342_v15 = vmul.f32 %v3523_v5, %v336_v4  ;;  %v3220_v61 = vld [vmem:[#allocation8 + $0x720] ss:$24 sps:$4 sm:$0xff]   ;;  %v3228_v63 = vld [vmem:[#allocation8 + $0x754] ss:$24 sps:$4 sm:$0xff]  }
 0x15c   : > { %v345_v1 = vmul.f32 %v3523_v5, %v339_v9  ;;  %v344_v16 = vmul.f32 %v3523_v5, %v338_v10  ;;  %v3223_v62 = vld [vmem:[#allocation8 + $0x128] ss:$24 sps:$4 sm:$0xff]   ;;  %v3231_v4 = vld [vmem:[#allocation8 + $0x15c] ss:$24 sps:$4 sm:$0xff]   ;;  %v3237_v9 = vld [vmem:[#allocation8 + $0x18c] ss:$24 sps:$4 sm:$0xff]  }
 0x15d   : > { %v378_v2 = vmul.f32 %v354_v53, %v341_v11  ;;  %v380_v17 = vmul.f32 %v362_v54, %v343_v12  ;;  %v377_v18 = vmul.f32 %v350_v55, %v340_v13  ;;  %v379_v19 = vmul.f32 %v358_v56, %v342_v15  ;;  %v3208_v53 = vld [vmem:[#allocation8 + $0x6c0] ss:$24 sps:$4 sm:$0xff]   ;;  %v3216_v55 = vld [vmem:[#allocation8 + $0x6f4] ss:$24 sps:$4 sm:$0xff]   ;;  %v3226_v5 = vld [vmem:[#allocation8 + $0x750] ss:$24 sps:$4 sm:$0xff]  }
 0x15e   : > { %v382_v20 = vmul.f32 %v370_v59, %v345_v1  ;;  %v381_v21 = vmul.f32 %v366_v60, %v344_v16  ;;  %v3211_v54 = vld [vmem:[#allocation8 + $0xc8] ss:$24 sps:$4 sm:$0xff]   ;;  %v3219_v56 = vld [vmem:[#allocation8 + $0xfc] ss:$24 sps:$4 sm:$0xff]   ;;  %v3225_v60 = vld [vmem:[#allocation8 + $0x12c] ss:$24 sps:$4 sm:$0xff]  }
 0x15f   : > { %v416_v22 = vadd.f32 %v392_v57, %v378_v2  ;;  %v418_v14 = vadd.f32 %v400_v58, %v380_v17  ;;  %v415_v23 = vadd.f32 %v388_v6, %v377_v18  ;;  %v417_v8 = vadd.f32 %v396_v7, %v379_v19  ;;  %v3214_v57 = vld [vmem:[#allocation8 + $0x6f0] ss:$24 sps:$4 sm:$0xff]   ;;  %v3222_v59 = vld [vmem:[#allocation8 + $0x724] ss:$24 sps:$4 sm:$0xff]   ;;  %v3232_v10 = vld [vmem:[#allocation8 + $0x780] ss:$24 sps:$4 sm:$0xff]  }
 0x160   : > { %v420_v24 = vadd.f32 %v408_v3, %v382_v20  ;;  %v4075_v25 = vadd.f32 %v404_v0, %v381_v21  ;;  %v3217_v58 = vld [vmem:[#allocation8 + $0xf8] ss:$24 sps:$4 sm:$0xff]   ;;  %v3234_v7 = vld [vmem:[#allocation8 + $0x784] ss:$24 sps:$4 sm:$0xff]   ;;  %v3235_v11 = vld [vmem:[#allocation8 + $0x188] ss:$24 sps:$4 sm:$0xff]  }
 0x161   : > { %v4077_v26 = vpack.c.bf16 %v416_v22, %v416_v22  ;;  %v4079_v27 = vpack.c.bf16 %v418_v14, %v418_v14  ;;  %v4081_v30 = vpack.c.bf16 %v415_v23, %v415_v23  ;;  %v4083_v31 = vpack.c.bf16 %v417_v8, %v417_v8  ;;  %v3229_v6 = vld [vmem:[#allocation8 + $0x158] ss:$24 sps:$4 sm:$0xff]   ;;  %v3240_v12 = vld [vmem:[#allocation8 + $0x7b4] ss:$24 sps:$4 sm:$0xff]   ;;  %v3246_v3 = vld [vmem:[#allocation8 + $0x7e4] ss:$24 sps:$4 sm:$0xff]  }
 0x162   : > { %v4089_v34 = vpack.c.bf16 %v420_v24, %v420_v24  ;;  %v3243_v13 = vld [vmem:[#allocation8 + $0x1bc] ss:$24 sps:$4 sm:$0xff]   ;;  %v3238_v15 = vld [vmem:[#allocation8 + $0x7b0] ss:$24 sps:$4 sm:$0xff]   ;;  %v3249_v16 = vld [vmem:[#allocation8 + $0x1ec] ss:$24 sps:$4 sm:$0xff]  }
 0x163   : > { %2219 = vmatprep.mubr.bf16.mxu0 %v4077_v26  ;;  %2260 = vmatprep.mubr.bf16.mxu1 %v4079_v27  ;;  %v3241_v1 = vld [vmem:[#allocation8 + $0x1b8] ss:$24 sps:$4 sm:$0xff]   ;;  %v3247_v2 = vld [vmem:[#allocation8 + $0x1e8] ss:$24 sps:$4 sm:$0xff]   ;;  %v3252_v17 = vld [vmem:[#allocation8 + $0x814] ss:$24 sps:$4 sm:$0xff]  }
 0x164   : > { %2220 = vmatmul.mubr.bf16.vlgmr.msra.gmra.mrb[0].mxu0 %v4081_v30  ;;  %2261 = vmatmul.mubr.bf16.vlgmr.msra.gmra.mrb[0].mxu1 %v4083_v31  ;;  %v3244_v0 = vld [vmem:[#allocation8 + $0x7e0] ss:$24 sps:$4 sm:$0xff]   ;;  %v3255_v18 = vld [vmem:[#allocation8 + $0x21c] ss:$24 sps:$4 sm:$0xff]   ;;  %v3250_v19 = vld [vmem:[#allocation8 + $0x810] ss:$24 sps:$4 sm:$0xff]  }
 0x165   : > { %2270 = vmatpush1.bf16.msra.mxu0 %v3184_v28  ;;  %2311 = vmatpush1.bf16.msra.mxu1 %v3187_v29  ;;  %v3253_v20 = vld [vmem:[#allocation8 + $0x218] ss:$24 sps:$4 sm:$0xff]   ;;  %v3258_v21 = vld [vmem:[#allocation8 + $0x844] ss:$24 sps:$4 sm:$0xff]   ;;  %v3259_v23 = vld [vmem:[#allocation8 + $0x248] ss:$24 sps:$4 sm:$0xff]  }
 0x166   : > { %2301 = vmatprep.mubr.bf16.mxu0 %v4089_v34  ;;  %2342 = vmatprep.mubr.bf16.mxu1 %v4077_v26  ;;  %v3261_v22 = vld [vmem:[#allocation8 + $0x24c] ss:$24 sps:$4 sm:$0xff]   ;;  %v3256_v14 = vld [vmem:[#allocation8 + $0x840] ss:$24 sps:$4 sm:$0xff]   ;;  %v3267_v24 = vld [vmem:[#allocation8 + $0x27c] ss:$24 sps:$4 sm:$0xff]  }
 0x167   : > { %2271 = vmatprep.subr.bf16.mxu0 %v3192_v32  ;;  %2312 = vmatprep.subr.bf16.mxu1 %v3195_v33  ;;  %v3264_v8 = vld [vmem:[#allocation8 + $0x874] ss:$24 sps:$4 sm:$0xff]   ;;  %v3262_v28 = vld [vmem:[#allocation8 + $0x870] ss:$24 sps:$4 sm:$0xff]   ;;  %v3270_v32 = vld [vmem:[#allocation8 + $0x8a4] ss:$24 sps:$4 sm:$0xff]  }
 0x168   : > { %v3265_v29 = vld [vmem:[#allocation8 + $0x278] ss:$24 sps:$4 sm:$0xff]   ;;  %v3273_v33 = vld [vmem:[#allocation8 + $0x2ac] ss:$24 sps:$4 sm:$0xff]  }
 0x169   : > { %2272 = vmatpush1.bf16.msra.mxu0 %v3190_v35  ;;  %2313 = vmatpush1.bf16.msra.mxu1 %v3193_v36  ;;  %v3268_v35 = vld [vmem:[#allocation8 + $0x8a0] ss:$24 sps:$4 sm:$0xff]  }
 0x16a   : > { %2273 = vmatprep.subr.bf16.mxu0 %v3198_v37  ;;  %2314 = vmatprep.subr.bf16.mxu1 %v3201_v38  ;;  %v3271_v36 = vld [vmem:[#allocation8 + $0x2a8] ss:$24 sps:$4 sm:$0xff]   ;;  %v3276_v37 = vld [vmem:[#allocation8 + $0x8d4] ss:$24 sps:$4 sm:$0xff]  }
 0x16b   : > { %v3279_v38 = vld [vmem:[#allocation8 + $0x2dc] ss:$24 sps:$4 sm:$0xff]  }
 0x16d   : > { %2274 = vmatpush1.bf16.msra.mxu0 %v3196_v39  ;;  %2315 = vmatpush1.bf16.msra.mxu1 %v3199_v40  ;;  %v3274_v39 = vld [vmem:[#allocation8 + $0x8d0] ss:$24 sps:$4 sm:$0xff]  }
 0x16e   : > { %2275 = vmatprep.subr.bf16.mxu0 %v3204_v41  ;;  %2316 = vmatprep.subr.bf16.mxu1 %v3207_v42  ;;  %v3277_v40 = vld [vmem:[#allocation8 + $0x2d8] ss:$24 sps:$4 sm:$0xff]   ;;  %v3282_v41 = vld [vmem:[#allocation8 + $0x30c] ss:$24 sps:$4 sm:$0xff]  }
 0x16f   : > { %v3285_v42 = vld [vmem:[#allocation8 + $0x60c] ss:$24 sps:$4 sm:$0xff]  }
 0x171   : > { %2276 = vmatpush1.bf16.msra.mxu0 %v3202_v43  ;;  %2317 = vmatpush1.bf16.msra.mxu1 %v3205_v44  ;;  %v3280_v43 = vld [vmem:[#allocation8 + $0x308] ss:$24 sps:$4 sm:$0xff]   ;;  %v4095_v44 = vpack.c.bf16 %v4075_v25, %v4075_v25  ;;  %v3297_v25 = vld [vmem:[#allocation8 + $0x66c] ss:$24 sps:$4 sm:$0xff]  }
 0x172   : > { %2277 = vmatprep.subr.bf16.mxu0 %v3210_v49  ;;  %2318 = vmatprep.subr.bf16.mxu1 %v3213_v52  ;;  %v3283_v49 = vld [vmem:[#allocation8 + $0x608] ss:$24 sps:$4 sm:$0xff]   ;;  %v3288_v52 = vld [vmem:[#allocation8 + $0x33c] ss:$24 sps:$4 sm:$0xff]  }
 0x175   : > { %2278 = vmatpush1.bf16.msra.mxu0 %v3208_v53  ;;  %2319 = vmatpush1.bf16.msra.mxu1 %v3211_v54  ;;  %v3291_v53 = vld [vmem:[#allocation8 + $0x63c] ss:$24 sps:$4 sm:$0xff]   ;;  %v3286_v54 = vld [vmem:[#allocation8 + $0x338] ss:$24 sps:$4 sm:$0xff]  }
 0x176   : > { %2279 = vmatprep.subr.bf16.mxu0 %v3216_v55  ;;  %2320 = vmatprep.subr.bf16.mxu1 %v3219_v56  ;;  %v3289_v55 = vld [vmem:[#allocation8 + $0x638] ss:$24 sps:$4 sm:$0xff]   ;;  %v3294_v56 = vld [vmem:[#allocation8 + $0x36c] ss:$24 sps:$4 sm:$0xff]  }
 0x179   : > { %2280 = vmatpush1.bf16.msra.mxu0 %v3214_v57  ;;  %2321 = vmatpush1.bf16.msra.mxu1 %v3217_v58  ;;  %v3292_v57 = vld [vmem:[#allocation8 + $0x368] ss:$24 sps:$4 sm:$0xff]  }
 0x17a   : > { %2281 = vmatprep.subr.bf16.mxu0 %v3222_v59  ;;  %2322 = vmatprep.subr.bf16.mxu1 %v3225_v60  ;;  %v3295_v58 = vld [vmem:[#allocation8 + $0x668] ss:$24 sps:$4 sm:$0xff]   ;;  %v3300_v59 = vld [vmem:[#allocation8 + $0x39c] ss:$24 sps:$4 sm:$0xff]  }
 0x17b   : > { %v3303_v60 = vld [vmem:[#allocation8 + $0x69c] ss:$24 sps:$4 sm:$0xff]  }
 0x17d   : > { %2282 = vmatpush1.bf16.msra.mxu0 %v3220_v61  ;;  %2323 = vmatpush1.bf16.msra.mxu1 %v3223_v62  ;;  %v3298_v61 = vld [vmem:[#allocation8 + $0x398] ss:$24 sps:$4 sm:$0xff]  }
 0x17e   : > { %2283 = vmatprep.subr.bf16.mxu0 %v3228_v63  ;;  %2324 = vmatprep.subr.bf16.mxu1 %v3231_v4  ;;  %v3301_v62 = vld [vmem:[#allocation8 + $0x698] ss:$24 sps:$4 sm:$0xff]   ;;  %v3306_v63 = vld [vmem:[#allocation8 + $0x3cc] ss:$24 sps:$4 sm:$0xff]  }
 0x17f   : > { %v3309_v4 = vld [vmem:[#allocation8 + $0x6cc] ss:$24 sps:$4 sm:$0xff]  }
 0x181   : > { %2284 = vmatpush1.bf16.msra.mxu0 %v3226_v5  ;;  %2325 = vmatpush1.bf16.msra.mxu1 %v3229_v6  ;;  %v3304_v5 = vld [vmem:[#allocation8 + $0x3c8] ss:$24 sps:$4 sm:$0xff]  }
 0x182   : > { %2285 = vmatprep.subr.bf16.mxu0 %v3234_v7  ;;  %2326 = vmatprep.subr.bf16.mxu1 %v3237_v9  ;;  %v3307_v6 = vld [vmem:[#allocation8 + $0x6c8] ss:$24 sps:$4 sm:$0xff]   ;;  %v3312_v7 = vld [vmem:[#allocation8 + $0x3fc] ss:$24 sps:$4 sm:$0xff]  }
 0x183   : > { %v3315_v9 = vld [vmem:[#allocation8 + $0x6fc] ss:$24 sps:$4 sm:$0xff]  }
 0x185   : > { %2286 = vmatpush1.bf16.msra.mxu0 %v3232_v10  ;;  %2327 = vmatpush1.bf16.msra.mxu1 %v3235_v11  ;;  %v3310_v10 = vld [vmem:[#allocation8 + $0x3f8] ss:$24 sps:$4 sm:$0xff]  }
 0x186   : > { %2287 = vmatprep.subr.bf16.mxu0 %v3240_v12  ;;  %2328 = vmatprep.subr.bf16.mxu1 %v3243_v13  ;;  %v3313_v11 = vld [vmem:[#allocation8 + $0x6f8] ss:$24 sps:$4 sm:$0xff]   ;;  %v3318_v12 = vld [vmem:[#allocation8 + $0x42c] ss:$24 sps:$4 sm:$0xff]  }
 0x187   : > { %v3321_v13 = vld [vmem:[#allocation8 + $0x72c] ss:$24 sps:$4 sm:$0xff]  }
 0x189   : > { %2288 = vmatpush1.bf16.msra.mxu0 %v3238_v15  ;;  %2329 = vmatpush1.bf16.msra.mxu1 %v3241_v1  ;;  %v3316_v15 = vld [vmem:[#allocation8 + $0x428] ss:$24 sps:$4 sm:$0xff]  }
 0x18a   : > { %2289 = vmatprep.subr.bf16.mxu0 %v3246_v3  ;;  %2330 = vmatprep.subr.bf16.mxu1 %v3249_v16  ;;  %v3319_v1 = vld [vmem:[#allocation8 + $0x728] ss:$24 sps:$4 sm:$0xff]   ;;  %v3324_v3 = vld [vmem:[#allocation8 + $0x45c] ss:$24 sps:$4 sm:$0xff]  }
 0x18b   : > { %v3327_v16 = vld [vmem:[#allocation8 + $0x75c] ss:$24 sps:$4 sm:$0xff]  }
 0x18d   : > { %2290 = vmatpush1.bf16.msra.mxu0 %v3244_v0  ;;  %2331 = vmatpush1.bf16.msra.mxu1 %v3247_v2  ;;  %v3322_v0 = vld [vmem:[#allocation8 + $0x458] ss:$24 sps:$4 sm:$0xff]  }
 0x18e   : > { %2291 = vmatprep.subr.bf16.mxu0 %v3252_v17  ;;  %2332 = vmatprep.subr.bf16.mxu1 %v3255_v18  ;;  %v3325_v2 = vld [vmem:[#allocation8 + $0x758] ss:$24 sps:$4 sm:$0xff]   ;;  %v3330_v17 = vld [vmem:[#allocation8 + $0x48c] ss:$24 sps:$4 sm:$0xff]  }
 0x18f   : > { %v3333_v18 = vld [vmem:[#allocation8 + $0x78c] ss:$24 sps:$4 sm:$0xff]  }
 0x191   : > { %2292 = vmatpush1.bf16.msra.mxu0 %v3250_v19  ;;  %2333 = vmatpush1.bf16.msra.mxu1 %v3253_v20  ;;  %v3328_v19 = vld [vmem:[#allocation8 + $0x488] ss:$24 sps:$4 sm:$0xff]  }
 0x192   : > { %2293 = vmatprep.subr.bf16.mxu0 %v3258_v21  ;;  %2334 = vmatprep.subr.bf16.mxu1 %v3261_v22  ;;  %v3331_v20 = vld [vmem:[#allocation8 + $0x788] ss:$24 sps:$4 sm:$0xff]   ;;  %v3336_v21 = vld [vmem:[#allocation8 + $0x4bc] ss:$24 sps:$4 sm:$0xff]  }
 0x193   : > { %v3339_v22 = vld [vmem:[#allocation8 + $0x7bc] ss:$24 sps:$4 sm:$0xff]  }
 0x195   : > { %2294 = vmatpush1.bf16.msra.mxu0 %v3256_v14  ;;  %2335 = vmatpush1.bf16.msra.mxu1 %v3259_v23  ;;  %v3334_v14 = vld [vmem:[#allocation8 + $0x4b8] ss:$24 sps:$4 sm:$0xff]  }
 0x196   : > { %2295 = vmatprep.subr.bf16.mxu0 %v3264_v8  ;;  %2336 = vmatprep.subr.bf16.mxu1 %v3267_v24  ;;  %v3337_v23 = vld [vmem:[#allocation8 + $0x7b8] ss:$24 sps:$4 sm:$0xff]   ;;  %v3342_v8 = vld [vmem:[#allocation8 + $0x4ec] ss:$24 sps:$4 sm:$0xff]  }
 0x197   : > { %v3345_v24 = vld [vmem:[#allocation8 + $0x7ec] ss:$24 sps:$4 sm:$0xff]  }
 0x199   : > { %2296 = vmatpush1.bf16.msra.mxu0 %v3262_v28  ;;  %2337 = vmatpush1.bf16.msra.mxu1 %v3265_v29  ;;  %v3340_v28 = vld [vmem:[#allocation8 + $0x4e8] ss:$24 sps:$4 sm:$0xff]  }
 0x19a   : > { %2297 = vmatprep.subr.bf16.mxu0 %v3270_v32  ;;  %2338 = vmatprep.subr.bf16.mxu1 %v3273_v33  ;;  %v3343_v29 = vld [vmem:[#allocation8 + $0x7e8] ss:$24 sps:$4 sm:$0xff]   ;;  %v3348_v32 = vld [vmem:[#allocation8 + $0x51c] ss:$24 sps:$4 sm:$0xff]  }
 0x19b   : > { %v3351_v33 = vld [vmem:[#allocation8 + $0x81c] ss:$24 sps:$4 sm:$0xff]  }
 0x19d   : > { %2298 = vmatpush1.bf16.msra.mxu0 %v3268_v35  ;;  %2339 = vmatpush1.bf16.msra.mxu1 %v3271_v36  ;;  %v3346_v35 = vld [vmem:[#allocation8 + $0x518] ss:$24 sps:$4 sm:$0xff]  }
 0x19e   : > { %2299 = vmatprep.subr.bf16.mxu0 %v3276_v37  ;;  %2340 = vmatprep.subr.bf16.mxu1 %v3279_v38  ;;  %v3349_v36 = vld [vmem:[#allocation8 + $0x818] ss:$24 sps:$4 sm:$0xff]   ;;  %v3354_v37 = vld [vmem:[#allocation8 + $0x54c] ss:$24 sps:$4 sm:$0xff]  }
 0x19f   : > { %v3357_v38 = vld [vmem:[#allocation8 + $0x84c] ss:$24 sps:$4 sm:$0xff]  }
 0x1a1   : > { %2300 = vmatpush1.bf16.msra.mxu0 %v3274_v39  ;;  %2341 = vmatpush1.bf16.msra.mxu1 %v3277_v40  ;;  %v3352_v39 = vld [vmem:[#allocation8 + $0x548] ss:$24 sps:$4 sm:$0xff]  }
 0x1a2   : > { %2351 = vmatprep.subr.bf16.mxu0 %v3282_v41  ;;  %2392 = vmatprep.subr.bf16.mxu1 %v3285_v42  ;;  %v3355_v40 = vld [vmem:[#allocation8 + $0x848] ss:$24 sps:$4 sm:$0xff]   ;;  %v3360_v41 = vld [vmem:[#allocation8 + $0x57c] ss:$24 sps:$4 sm:$0xff]  }
 0x1a3   : > { %v3363_v42 = vld [vmem:[#allocation8 + $0x87c] ss:$24 sps:$4 sm:$0xff]  }
 0x1a4   : > { %2302 = vmatmul.mubr.bf16.vlgmr.msra.gmra.mrb[4].mxu0 %v4095_v44  ;;  %2343 = vmatmul.mubr.bf16.vlgmr.msra.gmra.mrb[4].mxu1 %v4081_v30 }
 0x1a5   : > { %2352 = vmatpush1.bf16.msra.mxu0 %v3280_v43  ;;  %2383 = vmatprep.mubr.bf16.mxu0 %v4079_v27  ;;  %v3358_v43 = vld [vmem:[#allocation8 + $0x578] ss:$24 sps:$4 sm:$0xff]  }
 0x1a6   : > { %2393 = vmatpush1.bf16.msra.mxu1 %v3283_v49  ;;  %2424 = vmatprep.mubr.bf16.mxu1 %v4089_v34  ;;  %v3361_v49 = vld [vmem:[#allocation8 + $0x878] ss:$24 sps:$4 sm:$0xff]  }
 0x1a7   : > { %2353 = vmatprep.subr.bf16.mxu0 %v3288_v52  ;;  %2394 = vmatprep.subr.bf16.mxu1 %v3291_v53  ;;  %v3366_v52 = vld [vmem:[#allocation8 + $0x5ac] ss:$24 sps:$4 sm:$0xff]  }
 0x1a8   : > { %v3369_v53 = vld [vmem:[#allocation8 + $0x8ac] ss:$24 sps:$4 sm:$0xff]  }
 0x1a9   : > { %2354 = vmatpush1.bf16.msra.mxu0 %v3286_v54  ;;  %v3364_v54 = vld [vmem:[#allocation8 + $0x5a8] ss:$24 sps:$4 sm:$0xff]  }
 0x1aa   : > { %2395 = vmatpush1.bf16.msra.mxu1 %v3289_v55  ;;  %2355 = vmatprep.subr.bf16.mxu0 %v3294_v56  ;;  %v3367_v55 = vld [vmem:[#allocation8 + $0x8a8] ss:$24 sps:$4 sm:$0xff]   ;;  %v3372_v56 = vld [vmem:[#allocation8 + $0x5dc] ss:$24 sps:$4 sm:$0xff]  }
 0x1ab   : > { %2396 = vmatprep.subr.bf16.mxu1 %v3297_v25  ;;  %v3375_v25 = vld [vmem:[#allocation8 + $0x8dc] ss:$24 sps:$4 sm:$0xff]  }
 0x1ad   : > { %2356 = vmatpush1.bf16.msra.mxu0 %v3292_v57  ;;  %v3370_v57 = vld [vmem:[#allocation8 + $0x5d8] ss:$24 sps:$4 sm:$0xff]  }
 0x1ae   : > { %2397 = vmatpush1.bf16.msra.mxu1 %v3295_v58  ;;  %2357 = vmatprep.subr.bf16.mxu0 %v3300_v59  ;;  %v3373_v58 = vld [vmem:[#allocation8 + $0x8d8] ss:$24 sps:$4 sm:$0xff]   ;;  %v3378_v59 = vld [vmem:[#allocation8 + $0x14] ss:$24 sps:$4 sm:$0xff]  }
 0x1af   : > { %2398 = vmatprep.subr.bf16.mxu1 %v3303_v60  ;;  %v3381_v60 = vld [vmem:[#allocation8 + $0x314] ss:$24 sps:$4 sm:$0xff]  }
 0x1b1   : > { %2358 = vmatpush1.bf16.msra.mxu0 %v3298_v61  ;;  %v3376_v61 = vld [vmem:[#allocation8 + $0x10] ss:$24 sps:$4 sm:$0xff]  }
 0x1b2   : > { %2399 = vmatpush1.bf16.msra.mxu1 %v3301_v62  ;;  %2359 = vmatprep.subr.bf16.mxu0 %v3306_v63  ;;  %v3379_v62 = vld [vmem:[#allocation8 + $0x310] ss:$24 sps:$4 sm:$0xff]   ;;  %v3384_v63 = vld [vmem:[#allocation8 + $0x44] ss:$24 sps:$4 sm:$0xff]  }
 0x1b3   : > { %2400 = vmatprep.subr.bf16.mxu1 %v3309_v4  ;;  %v3387_v4 = vld [vmem:[#allocation8 + $0x344] ss:$24 sps:$4 sm:$0xff]  }
 0x1b5   : > { %2360 = vmatpush1.bf16.msra.mxu0 %v3304_v5  ;;  %v3382_v5 = vld [vmem:[#allocation8 + $0x40] ss:$24 sps:$4 sm:$0xff]  }
 0x1b6   : > { %2401 = vmatpush1.bf16.msra.mxu1 %v3307_v6  ;;  %2361 = vmatprep.subr.bf16.mxu0 %v3312_v7  ;;  %v3385_v6 = vld [vmem:[#allocation8 + $0x340] ss:$24 sps:$4 sm:$0xff]   ;;  %v3390_v7 = vld [vmem:[#allocation8 + $0x74] ss:$24 sps:$4 sm:$0xff]  }
 0x1b7   : > { %2402 = vmatprep.subr.bf16.mxu1 %v3315_v9  ;;  %v3393_v9 = vld [vmem:[#allocation8 + $0x374] ss:$24 sps:$4 sm:$0xff]  }
 0x1b9   : > { %2362 = vmatpush1.bf16.msra.mxu0 %v3310_v10  ;;  %v3388_v10 = vld [vmem:[#allocation8 + $0x70] ss:$24 sps:$4 sm:$0xff]  }
 0x1ba   : > { %2403 = vmatpush1.bf16.msra.mxu1 %v3313_v11  ;;  %2363 = vmatprep.subr.bf16.mxu0 %v3318_v12  ;;  %v3391_v11 = vld [vmem:[#allocation8 + $0x370] ss:$24 sps:$4 sm:$0xff]   ;;  %v3396_v12 = vld [vmem:[#allocation8 + $0xa4] ss:$24 sps:$4 sm:$0xff]  }
 0x1bb   : > { %2404 = vmatprep.subr.bf16.mxu1 %v3321_v13  ;;  %v3399_v13 = vld [vmem:[#allocation8 + $0x3a4] ss:$24 sps:$4 sm:$0xff]  }
 0x1bd   : > { %2364 = vmatpush1.bf16.msra.mxu0 %v3316_v15  ;;  %v3394_v15 = vld [vmem:[#allocation8 + $0xa0] ss:$24 sps:$4 sm:$0xff]  }
 0x1be   : > { %2405 = vmatpush1.bf16.msra.mxu1 %v3319_v1  ;;  %2365 = vmatprep.subr.bf16.mxu0 %v3324_v3  ;;  %v3402_v1 = vld [vmem:[#allocation8 + $0xd4] ss:$24 sps:$4 sm:$0xff]  }
 0x1bf   : > { %2406 = vmatprep.subr.bf16.mxu1 %v3327_v16  ;;  %v3405_v3 = vld [vmem:[#allocation8 + $0x3d4] ss:$24 sps:$4 sm:$0xff]   ;;  %v3403_v16 = vld [vmem:[#allocation8 + $0x3d0] ss:$24 sps:$4 sm:$0xff]  }
 0x1c1   : > { %2366 = vmatpush1.bf16.msra.mxu0 %v3322_v0  ;;  %v3408_v0 = vld [vmem:[#allocation8 + $0x104] ss:$24 sps:$4 sm:$0xff]  }
 0x1c2   : > { %2407 = vmatpush1.bf16.msra.mxu1 %v3325_v2  ;;  %2367 = vmatprep.subr.bf16.mxu0 %v3330_v17  ;;  %v3411_v2 = vld [vmem:[#allocation8 + $0x404] ss:$24 sps:$4 sm:$0xff]   ;;  %v3406_v17 = vld [vmem:[#allocation8 + $0x100] ss:$24 sps:$4 sm:$0xff]  }
 0x1c3   : > { %2408 = vmatprep.subr.bf16.mxu1 %v3333_v18  ;;  %v3409_v18 = vld [vmem:[#allocation8 + $0x400] ss:$24 sps:$4 sm:$0xff]  }
 0x1c5   : > { %2368 = vmatpush1.bf16.msra.mxu0 %v3328_v19  ;;  %v3414_v19 = vld [vmem:[#allocation8 + $0x134] ss:$24 sps:$4 sm:$0xff]  }
 0x1c6   : > { %2409 = vmatpush1.bf16.msra.mxu1 %v3331_v20  ;;  %2369 = vmatprep.subr.bf16.mxu0 %v3336_v21  ;;  %v3417_v20 = vld [vmem:[#allocation8 + $0x434] ss:$24 sps:$4 sm:$0xff]   ;;  %v3412_v21 = vld [vmem:[#allocation8 + $0x130] ss:$24 sps:$4 sm:$0xff]  }
 0x1c7   : > { %2410 = vmatprep.subr.bf16.mxu1 %v3339_v22  ;;  %v3415_v22 = vld [vmem:[#allocation8 + $0x430] ss:$24 sps:$4 sm:$0xff]  }
 0x1c9   : > { %2370 = vmatpush1.bf16.msra.mxu0 %v3334_v14  ;;  %v3420_v14 = vld [vmem:[#allocation8 + $0x164] ss:$24 sps:$4 sm:$0xff]  }
 0x1ca   : > { %2411 = vmatpush1.bf16.msra.mxu1 %v3337_v23  ;;  %2371 = vmatprep.subr.bf16.mxu0 %v3342_v8  ;;  %v3423_v23 = vld [vmem:[#allocation8 + $0x464] ss:$24 sps:$4 sm:$0xff]   ;;  %v3418_v8 = vld [vmem:[#allocation8 + $0x160] ss:$24 sps:$4 sm:$0xff]  }
 0x1cb   : > { %2412 = vmatprep.subr.bf16.mxu1 %v3345_v24  ;;  %v3421_v24 = vld [vmem:[#allocation8 + $0x460] ss:$24 sps:$4 sm:$0xff]  }
 0x1cd   : > { %2372 = vmatpush1.bf16.msra.mxu0 %v3340_v28  ;;  %v3426_v28 = vld [vmem:[#allocation8 + $0x194] ss:$24 sps:$4 sm:$0xff]  }
 0x1ce   : > { %2413 = vmatpush1.bf16.msra.mxu1 %v3343_v29  ;;  %2373 = vmatprep.subr.bf16.mxu0 %v3348_v32  ;;  %v3429_v29 = vld [vmem:[#allocation8 + $0x494] ss:$24 sps:$4 sm:$0xff]   ;;  %v3424_v32 = vld [vmem:[#allocation8 + $0x190] ss:$24 sps:$4 sm:$0xff]  }
 0x1cf   : > { %2414 = vmatprep.subr.bf16.mxu1 %v3351_v33  ;;  %v3427_v33 = vld [vmem:[#allocation8 + $0x490] ss:$24 sps:$4 sm:$0xff]  }
 0x1d1   : > { %2374 = vmatpush1.bf16.msra.mxu0 %v3346_v35  ;;  %v3432_v35 = vld [vmem:[#allocation8 + $0x1c4] ss:$24 sps:$4 sm:$0xff]  }
 0x1d2   : > { %2415 = vmatpush1.bf16.msra.mxu1 %v3349_v36  ;;  %2375 = vmatprep.subr.bf16.mxu0 %v3354_v37  ;;  %v3435_v36 = vld [vmem:[#allocation8 + $0x4c4] ss:$24 sps:$4 sm:$0xff]   ;;  %v3430_v37 = vld [vmem:[#allocation8 + $0x1c0] ss:$24 sps:$4 sm:$0xff]  }
 0x1d3   : > { %2416 = vmatprep.subr.bf16.mxu1 %v3357_v38  ;;  %v3433_v38 = vld [vmem:[#allocation8 + $0x4c0] ss:$24 sps:$4 sm:$0xff]  }
 0x1d5   : > { %2376 = vmatpush1.bf16.msra.mxu0 %v3352_v39  ;;  %v3438_v39 = vld [vmem:[#allocation8 + $0x1f4] ss:$24 sps:$4 sm:$0xff]  }
 0x1d6   : > { %2417 = vmatpush1.bf16.msra.mxu1 %v3355_v40  ;;  %2377 = vmatprep.subr.bf16.mxu0 %v3360_v41  ;;  %v3441_v40 = vld [vmem:[#allocation8 + $0x4f4] ss:$24 sps:$4 sm:$0xff]   ;;  %v3436_v41 = vld [vmem:[#allocation8 + $0x1f0] ss:$24 sps:$4 sm:$0xff]  }
 0x1d7   : > { %2418 = vmatprep.subr.bf16.mxu1 %v3363_v42  ;;  %v3439_v42 = vld [vmem:[#allocation8 + $0x4f0] ss:$24 sps:$4 sm:$0xff]  }
 0x1d9   : > { %2378 = vmatpush1.bf16.msra.mxu0 %v3358_v43  ;;  %v3444_v43 = vld [vmem:[#allocation8 + $0x224] ss:$24 sps:$4 sm:$0xff]  }
 0x1da   : > { %2419 = vmatpush1.bf16.msra.mxu1 %v3361_v49  ;;  %2379 = vmatprep.subr.bf16.mxu0 %v3366_v52  ;;  %v3447_v49 = vld [vmem:[#allocation8 + $0x524] ss:$24 sps:$4 sm:$0xff]   ;;  %v3442_v52 = vld [vmem:[#allocation8 + $0x220] ss:$24 sps:$4 sm:$0xff]  }
 0x1db   : > { %2420 = vmatprep.subr.bf16.mxu1 %v3369_v53  ;;  %v3445_v53 = vld [vmem:[#allocation8 + $0x520] ss:$24 sps:$4 sm:$0xff]  }
 0x1dd   : > { %2380 = vmatpush1.bf16.msra.mxu0 %v3364_v54  ;;  %v3450_v54 = vld [vmem:[#allocation8 + $0x254] ss:$24 sps:$4 sm:$0xff]  }
 0x1de   : > { %2421 = vmatpush1.bf16.msra.mxu1 %v3367_v55  ;;  %2381 = vmatprep.subr.bf16.mxu0 %v3372_v56  ;;  %v3453_v55 = vld [vmem:[#allocation8 + $0x554] ss:$24 sps:$4 sm:$0xff]   ;;  %v3448_v56 = vld [vmem:[#allocation8 + $0x250] ss:$24 sps:$4 sm:$0xff]  }
 0x1df   : > { %2422 = vmatprep.subr.bf16.mxu1 %v3375_v25  ;;  %v3451_v25 = vld [vmem:[#allocation8 + $0x550] ss:$24 sps:$4 sm:$0xff]  }
 0x1e1   : > { %2382 = vmatpush1.bf16.msra.mxu0 %v3370_v57  ;;  %v3456_v57 = vld [vmem:[#allocation8 + $0x284] ss:$24 sps:$4 sm:$0xff]  }
 0x1e2   : > { %2423 = vmatpush1.bf16.msra.mxu1 %v3373_v58  ;;  %2433 = vmatprep.subr.bf16.mxu0 %v3378_v59  ;;  %v3459_v58 = vld [vmem:[#allocation8 + $0x584] ss:$24 sps:$4 sm:$0xff]   ;;  %v3454_v59 = vld [vmem:[#allocation8 + $0x280] ss:$24 sps:$4 sm:$0xff]  }
 0x1e3   : > { %2474 = vmatprep.subr.bf16.mxu1 %v3381_v60  ;;  %v3457_v60 = vld [vmem:[#allocation8 + $0x580] ss:$24 sps:$4 sm:$0xff]  }
 0x1e4   : > { %2384 = vmatmul.mubr.bf16.vlgmr.msra.gmra.mrb[8].mxu0 %v4083_v31 }
 0x1e5   : > { %2425 = vmatmul.mubr.bf16.vlgmr.msra.gmra.mrb[8].mxu1 %v4095_v44  ;;  %2434 = vmatpush1.bf16.msra.mxu0 %v3376_v61  ;;  %v3462_v61 = vld [vmem:[#allocation8 + $0x2b4] ss:$24 sps:$4 sm:$0xff]  }
 0x1e6   : > { %2465 = vmatprep.mubr.bf16.mxu0 %v4077_v26  ;;  %2475 = vmatpush1.bf16.msra.mxu1 %v3379_v62  ;;  %v3397_v26 = vld [vmem:[#allocation8 + $0x3a0] ss:$24 sps:$4 sm:$0xff]   ;;  %v3465_v62 = vld [vmem:[#allocation8 + $0x5b4] ss:$24 sps:$4 sm:$0xff]  }
 0x1e7   : > { %2506 = vmatprep.mubr.bf16.mxu1 %v4079_v27  ;;  %2435 = vmatprep.subr.bf16.mxu0 %v3384_v63  ;;  %v3400_v27 = vld [vmem:[#allocation8 + $0xd0] ss:$24 sps:$4 sm:$0xff]  }
 0x1e8   : > { %2476 = vmatprep.subr.bf16.mxu1 %v3387_v4  ;;  %v3460_v63 = vld [vmem:[#allocation8 + $0x2b0] ss:$24 sps:$4 sm:$0xff]  }
 0x1e9   : > { %2436 = vmatpush1.bf16.msra.mxu0 %v3382_v5  ;;  %v3463_v4 = vld [vmem:[#allocation8 + $0x5b0] ss:$24 sps:$4 sm:$0xff]   ;;  %v3468_v5 = vld [vmem:[#allocation8 + $0x2e4] ss:$24 sps:$4 sm:$0xff]  }
 0x1ea   : > { %2477 = vmatpush1.bf16.msra.mxu1 %v3385_v6  ;;  %2437 = vmatprep.subr.bf16.mxu0 %v3390_v7  ;;  %v3471_v6 = vld [vmem:[#allocation8 + $0x5e4] ss:$24 sps:$4 sm:$0xff]   ;;  %v3466_v7 = vld [vmem:[#allocation8 + $0x2e0] ss:$24 sps:$4 sm:$0xff]  }
 0x1eb   : > { %2478 = vmatprep.subr.bf16.mxu1 %v3393_v9  ;;  %v3469_v9 = vld [vmem:[#allocation8 + $0x5e0] ss:$24 sps:$4 sm:$0xff]  }
 0x1ed   : > { %2438 = vmatpush1.bf16.msra.mxu0 %v3388_v10  ;;  %v3474_v10 = vld [vmem:[#allocation8 + $0x614] ss:$24 sps:$4 sm:$0xff]  }
 0x1ee   : > { %2479 = vmatpush1.bf16.msra.mxu1 %v3391_v11  ;;  %2439 = vmatprep.subr.bf16.mxu0 %v3396_v12  ;;  %v3472_v11 = vld [vmem:[#allocation8 + $0x610] ss:$24 sps:$4 sm:$0xff]   ;;  %v3477_v12 = vld [vmem:[#allocation8 + $0x644] ss:$24 sps:$4 sm:$0xff]  }
 0x1ef   : > { %2480 = vmatprep.subr.bf16.mxu1 %v3399_v13  ;;  %v3475_v13 = vld [vmem:[#allocation8 + $0x640] ss:$24 sps:$4 sm:$0xff]  }
 0x1f1   : > { %2440 = vmatpush1.bf16.msra.mxu0 %v3394_v15  ;;  %v3480_v15 = vld [vmem:[#allocation8 + $0x674] ss:$24 sps:$4 sm:$0xff]  }
 0x1f2   : > { %2481 = vmatpush1.bf16.msra.mxu1 %v3397_v26  ;;  %2441 = vmatprep.subr.bf16.mxu0 %v3402_v1  ;;  %v3478_v26 = vld [vmem:[#allocation8 + $0x670] ss:$24 sps:$4 sm:$0xff]   ;;  %v3483_v1 = vld [vmem:[#allocation8 + $0x6a4] ss:$24 sps:$4 sm:$0xff]  }
 0x1f3   : > { %2482 = vmatprep.subr.bf16.mxu1 %v3405_v3  ;;  %v3481_v3 = vld [vmem:[#allocation8 + $0x6a0] ss:$24 sps:$4 sm:$0xff]  }
 0x1f5   : > { %2442 = vmatpush1.bf16.msra.mxu0 %v3400_v27  ;;  %v3486_v27 = vld [vmem:[#allocation8 + $0x6d4] ss:$24 sps:$4 sm:$0xff]  }
 0x1f6   : > { %2483 = vmatpush1.bf16.msra.mxu1 %v3403_v16  ;;  %2443 = vmatprep.subr.bf16.mxu0 %v3408_v0  ;;  %v3484_v16 = vld [vmem:[#allocation8 + $0x6d0] ss:$24 sps:$4 sm:$0xff]   ;;  %v4108_v0 = vld [vmem:[#allocation10] sm:$0x3f] }
 0x1f7   : > { %2484 = vmatprep.subr.bf16.mxu1 %v3411_v2  ;;  %v724_v2 = vrot.slane %v4108_v0, %v4045_v45  ;;  %v3493_v45 = vld [vmem:[#allocation8 + $0x760] ss:$24 sps:$4 sm:$0xff]  }
 0x1f9   : > { %2444 = vmatpush1.bf16.msra.mxu0 %v3406_v17  ;;  %v3492_v17 = vld [vmem:[#allocation8 + $0x734] ss:$24 sps:$4 sm:$0xff]  }
 0x1fa   : > { %2485 = vmatpush1.bf16.msra.mxu1 %v3409_v18  ;;  %2445 = vmatprep.subr.bf16.mxu0 %v3414_v19 }
 0x1fb   : > { %2486 = vmatprep.subr.bf16.mxu1 %v3417_v20 }
 0x1fd   : > { %2446 = vmatpush1.bf16.msra.mxu0 %v3412_v21 }
 0x1fe   : > { %2487 = vmatpush1.bf16.msra.mxu1 %v3415_v22  ;;  %2447 = vmatprep.subr.bf16.mxu0 %v3420_v14 }
 0x1ff   : > { %2488 = vmatprep.subr.bf16.mxu1 %v3423_v23 }
 0x201   : > { %2448 = vmatpush1.bf16.msra.mxu0 %v3418_v8 }
 0x202   : > { %2489 = vmatpush1.bf16.msra.mxu1 %v3421_v24  ;;  %2449 = vmatprep.subr.bf16.mxu0 %v3426_v28  ;;  %v3490_v24 = vld [vmem:[#allocation8 + $0x730] ss:$24 sps:$4 sm:$0xff]  }
 0x203   : > { %2490 = vmatprep.subr.bf16.mxu1 %v3429_v29 }
 0x205   : > { %2450 = vmatpush1.bf16.msra.mxu0 %v3424_v32  ;;  %v3495_v32 = vld [vmem:[#allocation8 + $0x764] ss:$24 sps:$4 sm:$0xff]  }
 0x206   : > { %2491 = vmatpush1.bf16.msra.mxu1 %v3427_v33  ;;  %2451 = vmatprep.subr.bf16.mxu0 %v3432_v35  ;;  %v3498_v35 = vld [vmem:[#allocation8 + $0x794] ss:$24 sps:$4 sm:$0xff]  }
 0x207   : > { %2492 = vmatprep.subr.bf16.mxu1 %v3435_v36  ;;  %v3496_v36 = vld [vmem:[#allocation8 + $0x790] ss:$24 sps:$4 sm:$0xff]  }
 0x209   : > { %2452 = vmatpush1.bf16.msra.mxu0 %v3430_v37  ;;  %v3501_v37 = vld [vmem:[#allocation8 + $0x7c4] ss:$24 sps:$4 sm:$0xff]  }
 0x20a   : > { %2493 = vmatpush1.bf16.msra.mxu1 %v3433_v38  ;;  %2453 = vmatprep.subr.bf16.mxu0 %v3438_v39  ;;  %v3499_v38 = vld [vmem:[#allocation8 + $0x7c0] ss:$24 sps:$4 sm:$0xff]   ;;  %v3504_v39 = vld [vmem:[#allocation8 + $0x7f4] ss:$24 sps:$4 sm:$0xff]  }
 0x20b   : > { %2494 = vmatprep.subr.bf16.mxu1 %v3441_v40  ;;  %v3502_v40 = vld [vmem:[#allocation8 + $0x7f0] ss:$24 sps:$4 sm:$0xff]  }
 0x20d   : > { %2454 = vmatpush1.bf16.msra.mxu0 %v3436_v41  ;;  %v3507_v41 = vld [vmem:[#allocation8 + $0x824] ss:$24 sps:$4 sm:$0xff]  }
 0x20e   : > { %2495 = vmatpush1.bf16.msra.mxu1 %v3439_v42  ;;  %2455 = vmatprep.subr.bf16.mxu0 %v3444_v43  ;;  %v3505_v42 = vld [vmem:[#allocation8 + $0x820] ss:$24 sps:$4 sm:$0xff]   ;;  %v3510_v43 = vld [vmem:[#allocation8 + $0x854] ss:$24 sps:$4 sm:$0xff]  }
 0x20f   : > { %2496 = vmatprep.subr.bf16.mxu1 %v3447_v49  ;;  %v3508_v49 = vld [vmem:[#allocation8 + $0x850] ss:$24 sps:$4 sm:$0xff]  }
 0x211   : > { %2456 = vmatpush1.bf16.msra.mxu0 %v3442_v52  ;;  %v3513_v52 = vld [vmem:[#allocation8 + $0x884] ss:$24 sps:$4 sm:$0xff]  }
 0x212   : > { %2497 = vmatpush1.bf16.msra.mxu1 %v3445_v53  ;;  %2457 = vmatprep.subr.bf16.mxu0 %v3450_v54  ;;  %v3511_v53 = vld [vmem:[#allocation8 + $0x880] ss:$24 sps:$4 sm:$0xff]   ;;  %v3516_v54 = vld [vmem:[#allocation8 + $0x8b4] ss:$24 sps:$4 sm:$0xff]  }
 0x213   : > { %2498 = vmatprep.subr.bf16.mxu1 %v3453_v55  ;;  %v3514_v55 = vld [vmem:[#allocation8 + $0x8b0] ss:$24 sps:$4 sm:$0xff]  }
 0x215   : > { %2458 = vmatpush1.bf16.msra.mxu0 %v3448_v56  ;;  %v3519_v56 = vld [vmem:[#allocation8 + $0x8e4] ss:$24 sps:$4 sm:$0xff]  }
 0x216   : > { %2499 = vmatpush1.bf16.msra.mxu1 %v3451_v25  ;;  %2459 = vmatprep.subr.bf16.mxu0 %v3456_v57  ;;  %v3517_v25 = vld [vmem:[#allocation8 + $0x8e0] ss:$24 sps:$4 sm:$0xff]  }
 0x217   : > { %2500 = vmatprep.subr.bf16.mxu1 %v3459_v58 }
 0x219   : > { %2460 = vmatpush1.bf16.msra.mxu0 %v3454_v59 }
 0x21a   : > { %2501 = vmatpush1.bf16.msra.mxu1 %v3457_v60  ;;  %2461 = vmatprep.subr.bf16.mxu0 %v3462_v61 }
 0x21b   : > { %2502 = vmatprep.subr.bf16.mxu1 %v3465_v62 }
 0x21d   : > { %2462 = vmatpush1.bf16.msra.mxu0 %v3460_v63 }
 0x21e   : > { %2503 = vmatpush1.bf16.msra.mxu1 %v3463_v4  ;;  %2463 = vmatprep.subr.bf16.mxu0 %v3468_v5  ;;  %v3524_v5 = vld [vmem:[%s3995_s29] sm:$0xff] }
 0x21f   : > { %2504 = vmatprep.subr.bf16.mxu1 %v3471_v6 }
 0x221   : > { %2464 = vmatpush1.bf16.msra.mxu0 %v3466_v7 }
 0x222   : > { %2505 = vmatpush1.bf16.msra.mxu1 %v3469_v9  ;;  %2515 = vmatprep.subr.bf16.mxu0 %v3474_v10  ;;  %v3525_v10 = vld [vmem:[%s3995_s29 + $0x8] sm:$0xff] }
 0x224   : > { %2466 = vmatmul.mubr.bf16.vlgmr.msra.gmra.mrb[12].mxu0 %v4081_v30  ;;  %v3489_v30 = vld [vmem:[#allocation8 + $0x704] ss:$24 sps:$4 sm:$0xff]  }
 0x225   : > { %2507 = vmatmul.mubr.bf16.vlgmr.msra.gmra.mrb[12].mxu1 %v4083_v31  ;;  %2516 = vmatpush1.bf16.msra.mxu0 %v3472_v11  ;;  %v720_v31 = vrot.slane %v4108_v0, %v4049_v47 }
 0x226   : > { %2547 = vmatprep.mubr.bf16.mxu0 %v4089_v34  ;;  %2517 = vmatprep.subr.bf16.mxu0 %v3477_v12  ;;  %v3487_v34 = vld [vmem:[#allocation8 + $0x700] ss:$24 sps:$4 sm:$0xff]   ;;  %v732_v12 = vrot.slane %v4108_v0, %v4047_v46 }
 0x227   : > { %v3527_v46 = vld [vmem:[%s3995_s29 + $0x18] sm:$0xff] }
 0x229   : > { %2518 = vmatpush1.bf16.msra.mxu0 %v3475_v13 }
 0x22a   : > { %2519 = vmatprep.subr.bf16.mxu0 %v3480_v15 }
 0x22d   : > { %2520 = vmatpush1.bf16.msra.mxu0 %v3478_v26 }
 0x22e   : > { %2521 = vmatprep.subr.bf16.mxu0 %v3483_v1 }
 0x231   : > { %2522 = vmatpush1.bf16.msra.mxu0 %v3481_v3 }
 0x232   : > { %2523 = vmatprep.subr.bf16.mxu0 %v3486_v27 }
 0x235   : > { %2524 = vmatpush1.bf16.msra.mxu0 %v3484_v16 }
 0x236   : > { %2525 = vmatprep.subr.bf16.mxu0 %v3489_v30 }
 0x237   : > { %v2221_v18 = vpop.f32.mrb[0].mxu0  ;;  %v2262_v19 = vpop.f32.mrb[0].mxu1 }
 0x238   : > { %v2222_v20 = vadd.f32 %v2221_v18, %v720_v31  ;;  %v2223_v21 = vpop.f32.mrb[1].mxu0  ;;  %v2264_v22 = vpop.f32.mrb[1].mxu1 }
 0x239   : > { %v2224_v14 = vadd.f32 %v2223_v21, %v724_v2  ;;  %2526 = vmatpush1.bf16.msra.mxu0 %v3487_v34  ;;  %v2225_v23 = vpop.f32.mrb[2].mxu0  ;;  %v2266_v8 = vpop.f32.mrb[2].mxu1 }
 0x23a   : > { %v2263_v28 = vadd.f32 %v2262_v19, %v2222_v20  ;;  %v2226_v29 = vpop.f32.mrb[3].mxu0  ;;  %v2267_v47 = vpop.f32.mrb[3].mxu1  ;;  %2527 = vmatprep.subr.bf16.mxu0 %v3492_v17  ;;  %v3526_v19 = vld [vmem:[%s3995_s29 + $0x10] sm:$0xff] }
 0x23b   : > { %v2265_v33 = vadd.f32 %v2264_v22, %v2224_v14  ;;  %v736_v22 = vrot.slane %v4108_v0, %v4055_v51  ;;  %v740_v14 = vrot.slane %v4108_v0, %v4053_v50 }
 0x23d   : > { %2528 = vmatpush1.bf16.msra.mxu0 %v3490_v24 }
 0x23e   : > { %2529 = vmatprep.subr.bf16.mxu0 %v3495_v32 }
 0x241   : > { %2530 = vmatpush1.bf16.msra.mxu0 %v3493_v45 }
 0x242   : > { %2531 = vmatprep.subr.bf16.mxu0 %v3498_v35 }
 0x245   : > { %2532 = vmatpush1.bf16.msra.mxu0 %v3496_v36 }
 0x246   : > { %2533 = vmatprep.subr.bf16.mxu0 %v3501_v37 }
 0x249   : > { %2534 = vmatpush1.bf16.msra.mxu0 %v3499_v38 }
 0x24a   : > { %2535 = vmatprep.subr.bf16.mxu0 %v3504_v39 }
 0x24d   : > { %2536 = vmatpush1.bf16.msra.mxu0 %v3502_v40  ;;  %v3528_v40 = vld [vmem:[%s3995_s29 + $0x20] sm:$0xff] }
 0x24e   : > { %2537 = vmatprep.subr.bf16.mxu0 %v3507_v41 }
 0x251   : > { %2538 = vmatpush1.bf16.msra.mxu0 %v3505_v42 }
 0x252   : > { %2539 = vmatprep.subr.bf16.mxu0 %v3510_v43  ;;  %v3529_v43 = vld [vmem:[%s3995_s29 + $0x28] sm:$0xff] }
 0x255   : > { %2540 = vmatpush1.bf16.msra.mxu0 %v3508_v49 }
 0x256   : > { %2541 = vmatprep.subr.bf16.mxu0 %v3513_v52 }
 0x259   : > { %2542 = vmatpush1.bf16.msra.mxu0 %v3511_v53 }
 0x25a   : > { %2543 = vmatprep.subr.bf16.mxu0 %v3516_v54 }
 0x25d   : > { %2544 = vmatpush1.bf16.msra.mxu0 %v3514_v55 }
 0x25e   : > { %2545 = vmatprep.subr.bf16.mxu0 %v3519_v56 }
 0x261   : > { %2546 = vmatpush1.bf16.msra.mxu0 %v3517_v25 }
 0x264   : > { %2548 = vmatmul.mubr.bf16.vlgmr.msra.gmra.mrb[16].mxu0 %v4095_v44  ;;  %v728_v44 = vrot.slane %v4108_v0, %v4051_v48 }
 0x277   : > { %v2303_v57 = vpop.f32.mrb[4].mxu0  ;;  %v2344_v58 = vpop.f32.mrb[4].mxu1 }
 0x278   : > { %v2304_v59 = vadd.f32 %v2303_v57, %v2263_v28  ;;  %v2305_v60 = vpop.f32.mrb[5].mxu0  ;;  %v2346_v61 = vpop.f32.mrb[5].mxu1  ;;  %v2345_v13 = vadd.f32 %v2344_v58, %v728_v44 }
 0x279   : > { %v2306_v62 = vadd.f32 %v2305_v60, %v2265_v33  ;;  %v2307_v63 = vpop.f32.mrb[6].mxu0  ;;  %v2348_v4 = vpop.f32.mrb[6].mxu1  ;;  %v2347_v15 = vadd.f32 %v2346_v61, %v732_v12 }
 0x27a   : > { %v2556_v6 = vadd.f32 %v3524_v5, %v2304_v59  ;;  %v2308_v7 = vpop.f32.mrb[7].mxu0  ;;  %v2349_v9 = vpop.f32.mrb[7].mxu1 }
 0x27b   : > { %v2557_v11 = vadd.f32 %v3525_v10, %v2306_v62 }
 0x27c   : > { %2562 = vst [vmem:[%s4119_s25] sm:$0xff] %v2556_v6 }
 0x27d   : > { %2563 = vst [vmem:[%s4119_s25 + $0x8] sm:$0xff] %v2557_v11 }
 0x2b7   : > { %v2385_v26 = vpop.f32.mrb[8].mxu0 }
 0x2b8   : > { %v2386_v1 = vadd.f32 %v2385_v26, %v2345_v13  ;;  %v2426_v3 = vpop.f32.mrb[8].mxu1  ;;  %v2387_v27 = vpop.f32.mrb[9].mxu0 }
 0x2b9   : > { %v2388_v16 = vadd.f32 %v2387_v27, %v2347_v15  ;;  %v2428_v30 = vpop.f32.mrb[9].mxu1  ;;  %v2389_v31 = vpop.f32.mrb[10].mxu0 }
 0x2ba   : > { %v2427_v34 = vadd.f32 %v2426_v3, %v2386_v1  ;;  %v2430_v2 = vpop.f32.mrb[10].mxu1  ;;  %v2390_v17 = vpop.f32.mrb[11].mxu0 }
 0x2bb   : > { %v2429_v48 = vadd.f32 %v2428_v30, %v2388_v16  ;;  %v2431_v18 = vpop.f32.mrb[11].mxu1 }
 0x2bc   : > { %v2558_v20 = vadd.f32 %v3526_v19, %v2427_v34 }
 0x2bd   : > { %v2559_v21 = vadd.f32 %v3527_v46, %v2429_v48 }
 0x2be   : > { %2564 = vst [vmem:[%s4119_s25 + $0x10] sm:$0xff] %v2558_v20 }
 0x2bf   : > { %2565 = vst [vmem:[%s4119_s25 + $0x18] sm:$0xff] %v2559_v21 }
 0x2f7   : > { %v2467_v23 = vpop.f32.mrb[12].mxu0 }
 0x2f8   : > { %v2468_v8 = vadd.f32 %v2467_v23, %v736_v22  ;;  %v2508_v24 = vpop.f32.mrb[12].mxu1  ;;  %v2469_v28 = vpop.f32.mrb[13].mxu0 }
 0x2f9   : > { %v2470_v29 = vadd.f32 %v2469_v28, %v740_v14  ;;  %v2510_v47 = vpop.f32.mrb[13].mxu1  ;;  %v2471_v32 = vpop.f32.mrb[14].mxu0 }
 0x2fa   : > { %v2509_v33 = vadd.f32 %v2508_v24, %v2468_v8  ;;  %v2512_v45 = vpop.f32.mrb[14].mxu1  ;;  %v2472_v35 = vpop.f32.mrb[15].mxu0 }
 0x2fb   : > { %v2511_v36 = vadd.f32 %v2510_v47, %v2470_v29  ;;  %v2513_v37 = vpop.f32.mrb[15].mxu1 }
 0x337   : > { %v2549_v51 = vpop.f32.mrb[16].mxu0 }
 0x338   : > { %v2550_v50 = vadd.f32 %v2549_v51, %v2509_v33  ;;  %v2551_v0 = vpop.f32.mrb[17].mxu0 }
 0x339   : > { %v2552_v38 = vadd.f32 %v2551_v0, %v2511_v36  ;;  %v2553_v39 = vpop.f32.mrb[18].mxu0 }
 0x33a   : > { %v2560_v41 = vadd.f32 %v3528_v40, %v2550_v50  ;;  %v2554_v42 = vpop.f32.mrb[19].mxu0 }
 0x33b   : > { %v2561_v49 = vadd.f32 %v3529_v43, %v2552_v38 }
 0x33c   : > { %2566 = vst [vmem:[%s4119_s25 + $0x20] sm:$0xff] %v2560_v41 }
 0x33d   : > { %2567 = vst [vmem:[%s4119_s25 + $0x28] sm:$0xff] %v2561_v49 }
 0x33e   : > { %3685 = shalt.err (!%p3682_p1)
}
 0x33f   : > { %s3686_s14 = scalar_lea.hbm %s4142_s17, 768  ;;  %s3690_s11 = scalar_lea.hbm %s4193_s5, 1536 }
 0x340   : > { %p3687_p3 = scmp.ne.s32.totalorder %s4142_s17, %s3686_s14  ;;  %p3691_p0 = scmp.lt.u32.totalorder %s4142_s17, %s4193_s5 }
 0x341   : > { %p3692_p2 = scmp.lt.u32.totalorder %s3690_s11, %s3686_s14  ;;  %p3694_p10 = scmp.lt.u32.totalorder %s3686_s14, %s4142_s17 }
 0x342   : > { %p3688_p9 = pnand %p3687_p3, %p4210_p6 }
 0x343   : > { %p3693_p8 = por %p3692_p2, %p3691_p0 }
 0x344   : > { %p3689_p13 = pneg %p3688_p9 }
 0x345   : > { %p3695_p11 = por %p3694_p10, %p3693_p8 }
 0x347   : > { %p3696_p12 = pnand %p3695_p11, %p3689_p13 }
 0x349   : > { %3699 = shalt.err (!%p3696_p12)
}
 0x34a   : > { %3017 = dma.vmem_to_hbm [thread:$0]  (%p4210_p6), %s4144_s12, 768, %s4142_s17, %s2569_s24  }
 0x34b PF: > { %s2595_s25 = sand.u32 1, %s3734_s18   ;;  %p4211_p5 = scmp.ne.s32.totalorder %s4203_s23, 0 }
 0x34c   : > { %p4212_p7 = scmp.ge.s32.totalorder %s3746_s21, 2  ;;  %s2596_s6 = scalar_lea.sflag [#allocation4], %s2595_s25 }
 0x34e   : > { %p3037_p4 = pnand %p4212_p7, %p4211_p5 }
 0x350   : > { %3729 = dma.done.wait (!%p3037_p4), %s2596_s6, 768  }
 0x351   : > { %3731 = vsyncadd (!%p3037_p4), %s2596_s6, 4294966528  ;;  %p20_p1 = scmp.ge.s32.totalorder %s3919_s28, 4   ;;  %s4213_s18 = smov %s3738_s19 }
 0x352   : > { %s4214_s19 = smov %s3742_s20  ;;  %s4215_s20 = smov %s3930_s27 }
 0x353   : > { %s4216_s21 = smov %s3919_s28  ;;  %22 = sbr.rel (!%p20_p1) target bundleno = 7 (0x7), region = 101 }
 0x35a   :  { %2601 = vsyncpa [#allocation3], 1 }
 0x35b   :  { %2603 = vsyncpa [#allocation3 + $0x1], 1 }
 0x35c   :  { %2604 = vsyncpa [#allocation6], 1 }
 0x35d   :  { %2605 = vsyncpa [#allocation9], 1 }
 0x35e   :  { %2606 = vsyncpa [#allocation4], 1 }
 0x35f   :  { %2608 = vsyncpa [#allocation4 + $0x1], 1 }

</bundles_post_ra>
